<compile_context>
chip_gen: v7x
topology: tpu7x:2x2x1
jax: 0.10.0
libtpu: 0.0.40
codegen_flags: <defaults>
</compile_context>

<pallas_src>
import jax
import jax.numpy as jnp
from jax.experimental import pallas as pl
from jax.experimental.pallas import tpu as pltpu

IN_FEATURES = 4
HIDDEN = 256
N_ACT_PAD = 8            # fc2 output rows padded to a full sublane group
DEFAULT_BLOCK_B = 4096   # batch rows (lanes) per grid step for large batches
VMEM_LIMIT_BYTES = 48 * 1024 * 1024


def _dqn_fwd_kernel(xT_ref, w1T_ref, b1T_ref, w2T_ref, b2T_ref, o_ref):
    xT = xT_ref[...]       # (4, TB)      batch on lanes
    w1T = w1T_ref[...]     # (256, 4)

    # fc1 on the VPU: 4 broadcast FMAs -> (256, TB), then bias + ReLU.
    # (K=4 is far too shallow to be worth an MXU push/pop.)
    h = (w1T[:, 0:1] * xT[0:1, :]
         + w1T[:, 1:2] * xT[1:2, :]
         + w1T[:, 2:3] * xT[2:3, :]
         + w1T[:, 3:4] * xT[3:4, :]
         + b1T_ref[...])
    h = jnp.maximum(h, 0.0)

    # fc2 on the MXU: (8, 256) @ (256, TB) -> (8, TB); lane-dense store.
    out = jnp.dot(w2T_ref[...], h,
                  precision=jax.lax.Precision.HIGHEST,
                  preferred_element_type=jnp.float32)
    o_ref[...] = (out + b2T_ref[...]).astype(o_ref.dtype)


def prepare_params(w1, b1, w2, b2):
    """One-time layout prep: transpose + zero-pad fc2 to 8 output sublanes."""
    n_actions = w2.shape[1]
    w1T = jnp.asarray(w1, jnp.float32).T                      # (256, 4)
    b1T = jnp.asarray(b1, jnp.float32).reshape(HIDDEN, 1)     # (256, 1)
    w2Tp = jnp.zeros((N_ACT_PAD, HIDDEN), jnp.float32).at[:n_actions, :].set(
        jnp.asarray(w2, jnp.float32).T)                       # (8, 256)
    b2Tp = jnp.zeros((N_ACT_PAD, 1), jnp.float32).at[:n_actions, :].set(
        jnp.asarray(b2, jnp.float32).reshape(n_actions, 1))   # (8, 1)
    return w1T, b1T, w2Tp, b2Tp


def _choose_tile(batch_lanes, block_b):
    """Pick the per-step batch tile (multiple of 128 lanes)."""
    block_b = max(128, (block_b // 128) * 128)
    if batch_lanes <= 128:
        return 128                              # tiny batch: single step
    if batch_lanes <= 2 * block_b:
        m = batch_lanes // 128
        return ((m + 1) // 2) * 128             # exactly 2 steps (v7x megacore)
    return block_b                              # big batch: full-size tiles


def dqn_forward(x, w1T, b1T, w2Tp, b2Tp, n_actions, *, block_b=DEFAULT_BLOCK_B):
    """x: (B, 4) f32; returns (B, n_actions) f32."""
    B = x.shape[0]

    B_lane = pl.cdiv(B, 128) * 128
    TB = _choose_tile(B_lane, block_b)
    B_grid = pl.cdiv(B_lane, TB) * TB

    # Lane-dense transposed input, zero-padded along the batch (lane) axis.
    xT = jnp.pad(jnp.asarray(x, jnp.float32).T, ((0, 0), (0, B_grid - B)))

    outT = pl.pallas_call(
        _dqn_fwd_kernel,
        out_shape=jax.ShapeDtypeStruct((N_ACT_PAD, B_grid), jnp.float32),
        grid=(B_grid // TB,),
        in_specs=[
            pl.BlockSpec((IN_FEATURES, TB), lambda i: (0, i)),       # x^T tile
            pl.BlockSpec((HIDDEN, IN_FEATURES), lambda i: (0, 0)),   # w1^T resident
            pl.BlockSpec((HIDDEN, 1), lambda i: (0, 0)),             # b1 resident
            pl.BlockSpec((N_ACT_PAD, HIDDEN), lambda i: (0, 0)),     # w2^T resident
            pl.BlockSpec((N_ACT_PAD, 1), lambda i: (0, 0)),          # b2 resident
        ],
        out_specs=pl.BlockSpec((N_ACT_PAD, TB), lambda i: (0, i)),
        compiler_params=pltpu.CompilerParams(
            dimension_semantics=("parallel",),
            vmem_limit_bytes=VMEM_LIMIT_BYTES),
    )(xT, w1T, b1T, w2Tp, b2Tp)

    # Padded batch lanes hold relu(b1)@w2+b2 garbage and padded action rows are
    # zero; both are sliced off here.  Never read the raw (8, B_grid) buffer.
    return outT[:n_actions, :B].T


def init_params(key, n_actions=2):
    """Deterministic init mimicking nn.Linear default (uniform +/- 1/sqrt(fan_in))."""
    k1, k2, k3, k4 = jax.random.split(key, 4)
    bound1 = 1.0 / jnp.sqrt(4.0)
    bound2 = 1.0 / jnp.sqrt(256.0)
    w1 = jax.random.uniform(k1, (IN_FEATURES, HIDDEN), jnp.float32, -bound1, bound1)
    b1 = jax.random.uniform(k2, (1, HIDDEN), jnp.float32, -bound1, bound1)
    w2 = jax.random.uniform(k3, (HIDDEN, n_actions), jnp.float32, -bound2, bound2)
    b2 = jax.random.uniform(k4, (1, n_actions), jnp.float32, -bound2, bound2)
    return w1, b1, w2, b2


def reference_forward(x, w1, b1, w2, b2):
    h = jnp.maximum(
        jnp.dot(x, w1, precision=jax.lax.Precision.HIGHEST) + b1, 0.0)
    return jnp.dot(h, w2, precision=jax.lax.Precision.HIGHEST) + b2


if __name__ == "__main__":
    key = jax.random.PRNGKey(0)
    k_x, k_x2, k_p = jax.random.split(key, 3)

    n_actions = 2  # CartPole
    w1, b1, w2, b2 = init_params(k_p, n_actions=n_actions)
    w1T, b1T, w2Tp, b2Tp = prepare_params(w1, b1, w2, b2)

    # Small inference-style batch (single grid step).
    batch = 8
    x = jax.random.normal(k_x, (batch, IN_FEATURES), jnp.float32)
    out = jax.block_until_ready(dqn_forward(x, w1T, b1T, w2Tp, b2Tp, n_actions))
    ref = reference_forward(x, w1, b1, w2, b2)
    assert out.shape == (batch, n_actions)
    assert jnp.allclose(out, ref, atol=1e-5, rtol=1e-5), "mismatch vs reference (small batch)"

    # Training-style batch exercising the 2-step parallel grid + lane padding.
    batch2 = 600
    x2 = jax.random.normal(k_x2, (batch2, IN_FEATURES), jnp.float32)
    out2 = jax.block_until_ready(dqn_forward(x2, w1T, b1T, w2Tp, b2Tp, n_actions))
    ref2 = reference_forward(x2, w1, b1, w2, b2)
    assert out2.shape == (batch2, n_actions)
    assert jnp.allclose(out2, ref2, atol=1e-5, rtol=1e-5), "mismatch vs reference (batched grid)"

    print("KERNEL_OK")
</pallas_src>

<mosaic_0001>
module attributes {stable_mosaic.version = 11 : i64} {
  func.func @_dqn_fwd_kernel(%arg0: i32, %arg1: memref<4x128xf32, #tpu.memory_space<vmem>>, %arg2: memref<256x4xf32, #tpu.memory_space<vmem>>, %arg3: memref<256x1xf32, #tpu.memory_space<vmem>>, %arg4: memref<8x256xf32, #tpu.memory_space<vmem>>, %arg5: memref<8x1xf32, #tpu.memory_space<vmem>>, %arg6: memref<8x128xf32, #tpu.memory_space<vmem>>) attributes {dimension_semantics = [#tpu.dimension_semantics<parallel>], iteration_bounds = array<i64: 1>, scalar_prefetch = 0 : i64, scratch_operands = 0 : i64, tpu.core_type = #tpu.core_type<tc>, window_params = [{transform_indices = @transform_0, window_bounds = array<i64: 4, 128>}, {pipeline_mode = #tpu.pipeline_mode<synchronous>, transform_indices = @transform_1, window_bounds = array<i64: 256, 4>}, {pipeline_mode = #tpu.pipeline_mode<synchronous>, transform_indices = @transform_2, window_bounds = array<i64: 256, 1>}, {pipeline_mode = #tpu.pipeline_mode<synchronous>, transform_indices = @transform_3, window_bounds = array<i64: 8, 256>}, {pipeline_mode = #tpu.pipeline_mode<synchronous>, transform_indices = @transform_4, window_bounds = array<i64: 8, 1>}, {transform_indices = @transform_5, window_bounds = array<i64: 8, 128>}]} {
    %c0 = arith.constant 0 : index
    %c0_0 = arith.constant 0 : index
    %0 = vector.load %arg1[%c0, %c0_0] : memref<4x128xf32, #tpu.memory_space<vmem>>, vector<4x128xf32>
    %c0_1 = arith.constant 0 : index
    %c0_2 = arith.constant 0 : index
    %1 = vector.load %arg2[%c0_1, %c0_2] : memref<256x4xf32, #tpu.memory_space<vmem>>, vector<256x4xf32>
    %2 = vector.extract_strided_slice %1 {offsets = [0, 0], sizes = [256, 1], strides = [1, 1]} : vector<256x4xf32> to vector<256x1xf32>
    %3 = vector.extract_strided_slice %0 {offsets = [0, 0], sizes = [1, 128], strides = [1, 1]} : vector<4x128xf32> to vector<1x128xf32>
    %4 = vector.broadcast %2 : vector<256x1xf32> to vector<256x128xf32>
    %5 = vector.broadcast %3 : vector<1x128xf32> to vector<256x128xf32>
    %6 = arith.mulf %4, %5 : vector<256x128xf32>
    %7 = vector.extract_strided_slice %1 {offsets = [0, 1], sizes = [256, 1], strides = [1, 1]} : vector<256x4xf32> to vector<256x1xf32>
    %8 = vector.extract_strided_slice %0 {offsets = [1, 0], sizes = [1, 128], strides = [1, 1]} : vector<4x128xf32> to vector<1x128xf32>
    %9 = vector.broadcast %7 : vector<256x1xf32> to vector<256x128xf32>
    %10 = vector.broadcast %8 : vector<1x128xf32> to vector<256x128xf32>
    %11 = arith.mulf %9, %10 : vector<256x128xf32>
    %12 = arith.addf %6, %11 : vector<256x128xf32>
    %13 = vector.extract_strided_slice %1 {offsets = [0, 2], sizes = [256, 1], strides = [1, 1]} : vector<256x4xf32> to vector<256x1xf32>
    %14 = vector.extract_strided_slice %0 {offsets = [2, 0], sizes = [1, 128], strides = [1, 1]} : vector<4x128xf32> to vector<1x128xf32>
    %15 = vector.broadcast %13 : vector<256x1xf32> to vector<256x128xf32>
    %16 = vector.broadcast %14 : vector<1x128xf32> to vector<256x128xf32>
    %17 = arith.mulf %15, %16 : vector<256x128xf32>
    %18 = arith.addf %12, %17 : vector<256x128xf32>
    %19 = vector.extract_strided_slice %1 {offsets = [0, 3], sizes = [256, 1], strides = [1, 1]} : vector<256x4xf32> to vector<256x1xf32>
    %20 = vector.extract_strided_slice %0 {offsets = [3, 0], sizes = [1, 128], strides = [1, 1]} : vector<4x128xf32> to vector<1x128xf32>
    %21 = vector.broadcast %19 : vector<256x1xf32> to vector<256x128xf32>
    %22 = vector.broadcast %20 : vector<1x128xf32> to vector<256x128xf32>
    %23 = arith.mulf %21, %22 : vector<256x128xf32>
    %24 = arith.addf %18, %23 : vector<256x128xf32>
    %c0_3 = arith.constant 0 : index
    %c0_4 = arith.constant 0 : index
    %25 = vector.load %arg3[%c0_3, %c0_4] : memref<256x1xf32, #tpu.memory_space<vmem>>, vector<256x1xf32>
    %26 = vector.broadcast %25 : vector<256x1xf32> to vector<256x128xf32>
    %27 = arith.addf %24, %26 : vector<256x128xf32>
    %cst = arith.constant 0.000000e+00 : f32
    %28 = vector.broadcast %cst : f32 to vector<256x128xf32>
    %29 = arith.maximumf %27, %28 : vector<256x128xf32>
    %c0_5 = arith.constant 0 : index
    %c0_6 = arith.constant 0 : index
    %30 = vector.load %arg4[%c0_5, %c0_6] : memref<8x256xf32, #tpu.memory_space<vmem>>, vector<8x256xf32>
    %cst_7 = arith.constant dense<0.000000e+00> : vector<8x128xf32>
    %31 = tpu.matmul %30, %29, %cst_7 {dimension_numbers = #tpu.dot_dimension_numbers<[1], [0], [0], [1], [0, 0, 1, 1], [], []>, precision = #tpu.contract_precision<fp32>} : vector<8x256xf32>, vector<256x128xf32>, vector<8x128xf32> -> vector<8x128xf32>
    %c0_8 = arith.constant 0 : index
    %c0_9 = arith.constant 0 : index
    %32 = vector.load %arg5[%c0_8, %c0_9] : memref<8x1xf32, #tpu.memory_space<vmem>>, vector<8x1xf32>
    %33 = vector.broadcast %32 : vector<8x1xf32> to vector<8x128xf32>
    %34 = arith.addf %31, %33 : vector<8x128xf32>
    %c0_10 = arith.constant 0 : index
    %c0_11 = arith.constant 0 : index
    %35 = vector.load %arg6[%c0_10, %c0_11] : memref<8x128xf32, #tpu.memory_space<vmem>>, vector<8x128xf32>
    tpu.vector_store %arg6[%c0_10, %c0_11], %34 {strides = array<i32>} : memref<8x128xf32, #tpu.memory_space<vmem>>, vector<8x128xf32>,
    return
  }
  func.func @transform_0(%arg0: i32) -> (i32, i32) {
    %c0_i32 = arith.constant 0 : i32
    %c0_i32_0 = arith.constant 0 : i32
    return %c0_i32, %arg0 : i32, i32
  }
  func.func @transform_1(%arg0: i32) -> (i32, i32) {
    %c0_i32 = arith.constant 0 : i32
    %c0_i32_0 = arith.constant 0 : i32
    %c0_i32_1 = arith.constant 0 : i32
    return %c0_i32, %c0_i32_0 : i32, i32
  }
  func.func @transform_2(%arg0: i32) -> (i32, i32) {
    %c0_i32 = arith.constant 0 : i32
    %c0_i32_0 = arith.constant 0 : i32
    %c0_i32_1 = arith.constant 0 : i32
    return %c0_i32, %c0_i32_0 : i32, i32
  }
  func.func @transform_3(%arg0: i32) -> (i32, i32) {
    %c0_i32 = arith.constant 0 : i32
    %c0_i32_0 = arith.constant 0 : i32
    %c0_i32_1 = arith.constant 0 : i32
    return %c0_i32, %c0_i32_0 : i32, i32
  }
  func.func @transform_4(%arg0: i32) -> (i32, i32) {
    %c0_i32 = arith.constant 0 : i32
    %c0_i32_0 = arith.constant 0 : i32
    %c0_i32_1 = arith.constant 0 : i32
    return %c0_i32, %c0_i32_0 : i32, i32
  }
  func.func @transform_5(%arg0: i32) -> (i32, i32) {
    %c0_i32 = arith.constant 0 : i32
    %c0_i32_0 = arith.constant 0 : i32
    return %c0_i32, %arg0 : i32, i32
  }
}

</mosaic_0001>

<bundles_post_ra>
// kernel: tpu_custom_call.1
= control target key start
LH: loop header
LB: loop body
LE: loop exit
PB: predicated region body
PF: predicated region fallthrough
CT: control target
= control target key end

     0   :  { %v3837_v2 = vmov 1   ;;  %v3843_v3 = vmov 0   ;;  %s3831_s0 = inlined_call_operand.vmem [shape: f32[4,128], index: 0, kind: input, shape index: {}]   ;;  %s3832_s1 = inlined_call_operand.vmem [shape: f32[256,4], index: 1, kind: input, shape index: {}]   ;;  %s3833_s2 = inlined_call_operand.vmem [shape: f32[256,1], index: 2, kind: input, shape index: {}]   ;;  %s3834_s3 = inlined_call_operand.vmem [shape: f32[8,256], index: 3, kind: input, shape index: {}]   ;;  %s3835_s4 = inlined_call_operand.vmem [shape: f32[8,1], index: 4, kind: input, shape index: {}]   ;;  %s3836_s5 = inlined_call_operand.hbm [shape: f32[8,128], index: 5, kind: output, shape index: {}]  }
   0x1   :  { %v2495_v0 = vld [vmem:[%s3832_s1 + $0x10] sm:$0xff]  ;;  %v2500_v1 = vld [vmem:[%s3832_s1] sm:$0xff]  ;;  %2387 = vset.pattern.permute.xlu0 %v3837_v2  ;;  %2386 = vset.pattern.permute.xlu1 %v3843_v3  ;;  %v2509_v4 = vld [vmem:[%s3832_s1 + $0x18] sm:$0xff] }
   0x2   :  { %66 = vperm.xlu1 %2386, %v2495_v0   ;;  %251 = vperm.xlu0 %2387, %v2500_v1   ;;  %v2516_v5 = vld [vmem:[%s3832_s1 + $0x28] sm:$0xff]  ;;  %v2523_v6 = vld [vmem:[%s3832_s1 + $0x38] sm:$0xff] }
   0x6   :  { %71 = vperm.xlu1 %2386, %v2509_v4   ;;  %263 = vperm.xlu0 %2387, %v2509_v4  }
   0xa   :  { %81 = vperm.xlu1 %2386, %v2516_v5   ;;  %271 = vperm.xlu0 %2387, %v2516_v5  }
   0xb   :  { %10 = vsyncpa [#allocation3], 0  ;;  %v2530_v7 = vld [vmem:[%s3832_s1 + $0x48] sm:$0xff]  ;;  %v2537_v8 = vld [vmem:[%s3832_s1 + $0x58] sm:$0xff]  ;;  %v3839_v20 = vmov 2   ;;  %v3841_v35 = vmov 3  }
   0xc   :  { %v2544_v9 = vld [vmem:[%s3832_s1 + $0x68] sm:$0xff]  ;;  %v2551_v10 = vld [vmem:[%s3832_s1 + $0x78] sm:$0xff]  ;;  %v2612_v19 = vld [vmem:[%s3832_s1 + $0x80] sm:$0xff] }
   0xd   :  { %v2558_v11 = vld [vmem:[%s3832_s1 + $0x88] sm:$0xff]  ;;  %v2565_v12 = vld [vmem:[%s3832_s1 + $0x98] sm:$0xff]  ;;  %v2628_v22 = vld [vmem:[%s3832_s1 + $0x90] sm:$0xff] }
   0xe   :  { %91 = vperm.xlu1 %2386, %v2523_v6   ;;  %279 = vperm.xlu0 %2387, %v2523_v6   ;;  %v2572_v13 = vld [vmem:[%s3832_s1 + $0xa8] sm:$0xff]  ;;  %v2579_v14 = vld [vmem:[%s3832_s1 + $0xb8] sm:$0xff]  ;;  %v2635_v23 = vld [vmem:[%s3832_s1 + $0x20] sm:$0xff] }
   0xf   :  { %v2586_v15 = vld [vmem:[%s3832_s1 + $0xc8] sm:$0xff]  ;;  %v2593_v16 = vld [vmem:[%s3832_s1 + $0xd8] sm:$0xff]  ;;  %v2642_v24 = vld [vmem:[%s3832_s1 + $0x30] sm:$0xff] }
  0x10   :  { %v2600_v17 = vld [vmem:[%s3832_s1 + $0xe8] sm:$0xff]  ;;  %v2605_v18 = vld [vmem:[%s3832_s1 + $0xf8] sm:$0xff]  ;;  %v2649_v25 = vld [vmem:[%s3832_s1 + $0x40] sm:$0xff] }
  0x11   :  { %3868 = vst [vmem:[#allocation5_spill] sm:$0xff] %v2605_v18  ;;  %v2620_v21 = vld [vmem:[%s3832_s1 + $0x8] sm:$0xff]  ;;  %v2654_v26 = vld [vmem:[%s3832_s1 + $0xb0] sm:$0xff]  ;;  %v2668_v28 = vld [vmem:[%s3832_s1 + $0x60] sm:$0xff] }
  0x12   :  { %101 = vperm.xlu1 %2386, %v2530_v7   ;;  %287 = vperm.xlu0 %2387, %v2530_v7   ;;  %v2661_v27 = vld [vmem:[%s3832_s1 + $0x50] sm:$0xff]  ;;  %v2689_v31 = vld [vmem:[%s3832_s1 + $0xe0] sm:$0xff]  ;;  %v855_v57 = vld [vmem:[%s3833_s2 + $0x88] sm:$0xff] }
  0x13   :  { %v2675_v29 = vld [vmem:[%s3832_s1 + $0x70] sm:$0xff]  ;;  %v2696_v32 = vld [vmem:[%s3832_s1 + $0xa0] sm:$0xff]  ;;  %v839_v62 = vld [vmem:[%s3833_s2 + $0x8] sm:$0xff] }
  0x14   :  { %3869 = vst [vmem:[#allocation6_spill] sm:$0xff] %v2675_v29  ;;  %v2680_v30 = vld [vmem:[%s3832_s1 + $0xd0] sm:$0xff]  ;;  %v2710_v34 = vld [vmem:[%s3832_s1 + $0xc0] sm:$0xff] }
  0x15   :  { %v2703_v33 = vld [vmem:[%s3832_s1 + $0xf0] sm:$0xff]  ;;  %v854_v54 = vld [vmem:[%s3833_s2 + $0x80] sm:$0xff] }
  0x16   :  { %111 = vperm.xlu1 %2386, %v2537_v8   ;;  %295 = vperm.xlu0 %2387, %v2537_v8  }
  0x1a   :  { %121 = vperm.xlu1 %2386, %v2544_v9   ;;  %303 = vperm.xlu0 %2387, %v2544_v9  }
  0x1e   :  { %131 = vperm.xlu1 %2386, %v2551_v10   ;;  %311 = vperm.xlu0 %2387, %v2551_v10  }
  0x22   :  { %141 = vperm.xlu1 %2386, %v2558_v11   ;;  %319 = vperm.xlu0 %2387, %v2558_v11  }
  0x26   :  { %151 = vperm.xlu1 %2386, %v2565_v12   ;;  %327 = vperm.xlu0 %2387, %v2565_v12  }
  0x2a   :  { %161 = vperm.xlu1 %2386, %v2572_v13   ;;  %335 = vperm.xlu0 %2387, %v2572_v13  }
  0x2e   :  { %171 = vperm.xlu1 %2386, %v2579_v14   ;;  %343 = vperm.xlu0 %2387, %v2579_v14  }
  0x32   :  { %181 = vperm.xlu1 %2386, %v2586_v15   ;;  %351 = vperm.xlu0 %2387, %v2586_v15  }
  0x36   :  { %191 = vperm.xlu1 %2386, %v2593_v16   ;;  %359 = vperm.xlu0 %2387, %v2593_v16  }
  0x3a   :  { %201 = vperm.xlu1 %2386, %v2600_v17   ;;  %375 = vperm.xlu0 %2387, %v2605_v18  }
  0x3e   :  { %211 = vperm.xlu1 %2386, %v2605_v18   ;;  %2419 = vset.pattern.permute.xlu0 %v3839_v20 }
  0x3f   :  { %511 = vperm.xlu0 %2419, %v2612_v19  }
  0x42   :  { %2388 = vset.pattern.permute.xlu1 %v3837_v2  ;;  %v856_v2 = vld [vmem:[%s3833_s2 + $0x90] sm:$0xff] }
  0x43   :  { %255 = vperm.xlu1 %2388, %v2620_v21   ;;  %451 = vperm.xlu0 %2419, %v2620_v21  }
  0x47   :  { %259 = vperm.xlu1 %2388, %v2495_v0   ;;  %519 = vperm.xlu0 %2419, %v2628_v22  }
  0x4b   :  { %267 = vperm.xlu1 %2388, %v2635_v23   ;;  %459 = vperm.xlu0 %2419, %v2509_v4  }
  0x4f   :  { %275 = vperm.xlu1 %2388, %v2642_v24   ;;  %531 = vperm.xlu0 %2419, %v2572_v13  }
  0x53   :  { %283 = vperm.xlu1 %2388, %v2649_v25   ;;  %535 = vperm.xlu0 %2419, %v2654_v26  }
  0x57   :  { %291 = vperm.xlu1 %2388, %v2661_v27   ;;  %475 = vperm.xlu0 %2419, %v2523_v6  }
  0x5b   :  { %299 = vperm.xlu1 %2388, %v2668_v28   ;;  %547 = vperm.xlu0 %2419, %v2586_v15  }
  0x5f   :  { %307 = vperm.xlu1 %2388, %v2675_v29   ;;  %551 = vperm.xlu0 %2419, %v2680_v30  }
  0x63   :  { %315 = vperm.xlu1 %2388, %v2612_v19   ;;  %491 = vperm.xlu0 %2419, %v2537_v8  }
  0x67   :  { %323 = vperm.xlu1 %2388, %v2628_v22   ;;  %559 = vperm.xlu0 %2419, %v2689_v31  }
  0x6b   :  { %331 = vperm.xlu1 %2388, %v2696_v32   ;;  %499 = vperm.xlu0 %2419, %v2544_v9  }
  0x6f   :  { %339 = vperm.xlu1 %2388, %v2654_v26   ;;  %567 = vperm.xlu0 %2419, %v2703_v33  }
  0x73   :  { %347 = vperm.xlu1 %2388, %v2710_v34   ;;  %507 = vperm.xlu0 %2419, %v2551_v10  }
  0x77   :  { %355 = vperm.xlu1 %2388, %v2680_v30   ;;  %2425 = vset.pattern.permute.xlu0 %v3841_v35 }
  0x78   :  { %711 = vperm.xlu0 %2425, %v2558_v11  }
  0x7b   :  { %363 = vperm.xlu1 %2388, %v2689_v31  }
  0x7c   :  { %719 = vperm.xlu0 %2425, %v2565_v12  }
  0x7f   :  { %2389 = vset.pattern.permute.xlu1 %v3839_v20 }
  0x80   :  { %515 = vperm.xlu1 %2389, %v2558_v11   ;;  %651 = vperm.xlu0 %2425, %v2495_v0  }
  0x81   :  { %v2722_v36 = vpop.permute.xlu1 %66  ;;  %v2724_v37 = vpop.permute.xlu0 %251 }
  0x84   :  { %447 = vperm.xlu1 %2389, %v2500_v1   ;;  %723 = vperm.xlu0 %2425, %v2696_v32  }
  0x85   :  { %v2728_v38 = vpop.permute.xlu1 %71  ;;  %v2730_v39 = vpop.permute.xlu0 %263 }
  0x88   :  { %2390 = vset.pattern.permute.xlu1 %v3841_v35  ;;  %735 = vperm.xlu0 %2425, %v2579_v14  }
  0x89   :  { %v2734_v40 = vpop.permute.xlu1 %81  ;;  %707 = vperm.xlu1 %2390, %v2612_v19   ;;  %v2737_v41 = vpop.permute.xlu0 %271 }
  0x8c   :  { %667 = vperm.xlu0 %2425, %v2642_v24  }
  0x8d   :  { %v2740_v42 = vpop.permute.xlu1 %91  ;;  %643 = vperm.xlu1 %2390, %v2500_v1   ;;  %v2743_v43 = vpop.permute.xlu0 %279 }
  0x8e   :  { %3870 = vst [vmem:[#allocation7_spill] sm:$0xff] %v2740_v42  ;;  %3871 = vst [vmem:[#allocation8_spill] sm:$0xff] %v2743_v43  ;;  %v869_v42 = vld [vmem:[%s3833_s2 + $0xf8] sm:$0xff] }
  0x90   :  { %739 = vperm.xlu0 %2425, %v2710_v34  }
  0x91   :  { %v2746_v44 = vpop.permute.xlu1 %101  ;;  %647 = vperm.xlu1 %2390, %v2620_v21   ;;  %v2749_v45 = vpop.permute.xlu0 %287 }
  0x92   :  { %3872 = vst [vmem:[#allocation9_spill] sm:$0xff] %v2746_v44  ;;  %3873 = vst [vmem:[#allocation10_spill] sm:$0xff] %v2749_v45 }
  0x94   :  { %747 = vperm.xlu0 %2425, %v2680_v30  }
  0x95   :  { %v2752_v46 = vpop.permute.xlu1 %111  ;;  %2391 = vset.pattern.permute.xlu1 %v3839_v20  ;;  %v2755_v47 = vpop.permute.xlu0 %295 }
  0x96   :  { %3874 = vst [vmem:[#allocation11_spill] sm:$0xff] %v2752_v46  ;;  %3875 = vst [vmem:[#allocation12_spill] sm:$0xff] %v2755_v47  ;;  %523 = vperm.xlu1 %2391, %v2565_v12  }
  0x98   :  { %695 = vperm.xlu0 %2425, %v2544_v9  }
  0x99   :  { %v2759_v48 = vpop.permute.xlu1 %121  ;;  %v2761_v49 = vpop.permute.xlu0 %303 }
  0x9a   :  { %455 = vperm.xlu1 %2391, %v2495_v0  }
  0x9c   :  { %767 = vperm.xlu0 %2425, %v2605_v18  }
  0x9d   :  { %v2765_v50 = vpop.permute.xlu1 %131  ;;  %v2767_v51 = vpop.permute.xlu0 %311 }
  0x9e   :  { %3876 = vst [vmem:[#allocation13_spill] sm:$0xff] %v2765_v50  ;;  %3877 = vst [vmem:[#allocation14_spill] sm:$0xff] %v2767_v51  ;;  %2392 = vset.pattern.permute.xlu1 %v3841_v35  ;;  %v3893_v50 = vmov 0  }
  0x9f   :  { %715 = vperm.xlu1 %2392, %v2628_v22  }
  0xa0   :  { %699 = vperm.xlu0 %2425, %v2675_v29  }
  0xa1   :  { %v2772_v52 = vpop.permute.xlu1 %141  ;;  %v2774_v53 = vpop.permute.xlu0 %319 }
  0xa3   :  { %2393 = vset.pattern.permute.xlu1 %v3843_v3 }
  0xa4   :  { %952 = vperm.xlu1 %2393, %v854_v54   ;;  %2428 = vset.pattern.permute.xlu0 %v3843_v3 }
  0xa5   :  { %v2781_v55 = vpop.permute.xlu1 %151  ;;  %56 = vperm.xlu0 %2428, %v2500_v1   ;;  %v2784_v56 = vpop.permute.xlu0 %327 }
  0xa8   :  { %957 = vperm.xlu1 %2393, %v855_v57  }
  0xa9   :  { %v2789_v58 = vpop.permute.xlu1 %161  ;;  %61 = vperm.xlu0 %2428, %v2620_v21   ;;  %v2792_v59 = vpop.permute.xlu0 %335 }
  0xac   :  { %2394 = vset.pattern.permute.xlu1 %v3841_v35 }
  0xad   :  { %v2795_v60 = vpop.permute.xlu1 %171  ;;  %655 = vperm.xlu1 %2394, %v2509_v4   ;;  %76 = vperm.xlu0 %2428, %v2635_v23   ;;  %v2799_v61 = vpop.permute.xlu0 %343 }
  0xae   :  { %3878 = vst [vmem:[#allocation15_spill] sm:$0xff] %v2795_v60  ;;  %3879 = vst [vmem:[#allocation16_spill] sm:$0xff] %v2799_v61 }
  0xb1   :  { %v2804_v63 = vpop.permute.xlu1 %181  ;;  %2395 = vset.pattern.permute.xlu1 %v3843_v3  ;;  %86 = vperm.xlu0 %2428, %v2642_v24   ;;  %v2808_v0 = vpop.permute.xlu0 %351 }
  0xb2   :  { %3880 = vst [vmem:[#allocation17_spill] sm:$0xff] %v2804_v63  ;;  %3881 = vst [vmem:[#allocation18_spill] sm:$0xff] %v2808_v0  ;;  %877 = vperm.xlu1 %2395, %v839_v62  }
  0xb5   :  { %v2810_v1 = vpop.permute.xlu1 %191  ;;  %96 = vperm.xlu0 %2428, %v2649_v25   ;;  %v2813_v4 = vpop.permute.xlu0 %359 }
  0xb6   :  { %3882 = vst [vmem:[#allocation19_spill] sm:$0xff] %v2810_v1  ;;  %3883 = vst [vmem:[#allocation20_spill] sm:$0xff] %v2813_v4  ;;  %2396 = vset.pattern.permute.xlu1 %v3839_v20 }
  0xb7   :  { %527 = vperm.xlu1 %2396, %v2696_v32  }
  0xb9   :  { %v2817_v9 = vpop.permute.xlu1 %201  ;;  %106 = vperm.xlu0 %2428, %v2661_v27   ;;  %v2820_v10 = vpop.permute.xlu0 %375 }
  0xba   :  { %3884 = vst [vmem:[#allocation21_spill] sm:$0xff] %v2817_v9  ;;  %3885 = vst [vmem:[#allocation22_spill] sm:$0xff] %v2820_v10 }
  0xbb   :  { %463 = vperm.xlu1 %2396, %v2635_v23  }
  0xbd   :  { %v2823_v11 = vpop.permute.xlu1 %211  ;;  %116 = vperm.xlu0 %2428, %v2668_v28  }
  0xbe   :  { %3886 = vst [vmem:[#allocation23_spill] sm:$0xff] %v2823_v11  ;;  %v2826_v12 = vpop.permute.xlu0 %511  ;;  %v3897_v11 = vmov 2  }
  0xbf   :  { %467 = vperm.xlu1 %2396, %v2516_v5  }
  0xc1   :  { %126 = vperm.xlu0 %2428, %v2675_v29  }
  0xc2   :  { %v2830_v21 = vpop.permute.xlu1 %255  ;;  %v2832_v54 = vpop.permute.xlu0 %451 }
  0xc3   :  { %2397 = vset.pattern.permute.xlu1 %v3841_v35 }
  0xc4   :  { %727 = vperm.xlu1 %2397, %v2572_v13   ;;  %v3888_v13 = vmov 3  }
  0xc5   :  { %136 = vperm.xlu0 %2428, %v2612_v19  }
  0xc6   :  { %v2837_v57 = vpop.permute.xlu1 %259  ;;  %v2839_v62 = vpop.permute.xlu0 %519 }
  0xc8   :  { %2398 = vset.pattern.permute.xlu1 %v3843_v3 }
  0xc9   :  { %962 = vperm.xlu1 %2398, %v856_v2   ;;  %146 = vperm.xlu0 %2428, %v2628_v22   ;;  %v841_v22 = vld [vmem:[%s3833_s2 + $0x18] sm:$0xff] }
  0xca   :  { %v2846_v20 = vpop.permute.xlu1 %267  ;;  %v2848_v35 = vpop.permute.xlu0 %459 }
  0xcb   :  { %3887 = vst [vmem:[#allocation24_spill] sm:$0xff] %v2846_v20 }
  0xcd   :  { %2399 = vset.pattern.permute.xlu1 %v3888_v13  ;;  %156 = vperm.xlu0 %2428, %v2696_v32  }
  0xce   :  { %v2852_v19 = vpop.permute.xlu1 %275  ;;  %659 = vperm.xlu1 %2399, %v2635_v23   ;;  %v2855_v51 = vpop.permute.xlu0 %531 }
  0xcf   :  { %3889 = vst [vmem:[#allocation25_spill] sm:$0xff] %v2855_v51 }
  0xd1   :  { %166 = vperm.xlu0 %2428, %v2654_v26  }
  0xd2   :  { %v2858_v3 = vpop.permute.xlu1 %283  ;;  %663 = vperm.xlu1 %2399, %v2516_v5   ;;  %v2861_v2 = vpop.permute.xlu0 %535 }
  0xd3   :  { %3890 = vst [vmem:[#allocation26_spill] sm:$0xff] %v2858_v3  ;;  %3891 = vst [vmem:[#allocation27_spill] sm:$0xff] %v2861_v2  ;;  %v846_v3 = vld [vmem:[%s3833_s2 + $0x40] sm:$0xff] }
  0xd5   :  { %176 = vperm.xlu0 %2428, %v2710_v34  }
  0xd6   :  { %v2867_v32 = vpop.permute.xlu1 %291  ;;  %2400 = vset.pattern.permute.xlu1 %v3893_v50  ;;  %v2870_v23 = vpop.permute.xlu0 %475 }
  0xd7   :  { %3892 = vst [vmem:[#allocation28_spill] sm:$0xff] %v2867_v32  ;;  %3894 = vst [vmem:[#allocation29_spill] sm:$0xff] %v2870_v23  ;;  %887 = vperm.xlu1 %2400, %v841_v22   ;;  %v859_v32 = vld [vmem:[%s3833_s2 + $0xa8] sm:$0xff] }
  0xd9   :  { %186 = vperm.xlu0 %2428, %v2680_v30  }
  0xda   :  { %v2873_v9 = vpop.permute.xlu1 %299  ;;  %v2875_v5 = vpop.permute.xlu0 %547 }
  0xdb   :  { %3895 = vst [vmem:[#allocation30_spill] sm:$0xff] %v2873_v9  ;;  %3896 = vst [vmem:[#allocation31_spill] sm:$0xff] %v2875_v5  ;;  %2401 = vset.pattern.permute.xlu1 %v3897_v11  ;;  %v838_v9 = vld [vmem:[%s3833_s2] sm:$0xff] }
  0xdc   :  { %539 = vperm.xlu1 %2401, %v2579_v14  }
  0xdd   :  { %196 = vperm.xlu0 %2428, %v2689_v31  }
  0xde   :  { %v2880_v10 = vpop.permute.xlu1 %307  ;;  %v2882_v47 = vpop.permute.xlu0 %551 }
  0xdf   :  { %3898 = vst [vmem:[#allocation32_spill] sm:$0xff] %v2880_v10 }
  0xe0   :  { %471 = vperm.xlu1 %2401, %v2642_v24   ;;  %v857_v24 = vld [vmem:[%s3833_s2 + $0x98] sm:$0xff] }
  0xe1   :  { %206 = vperm.xlu0 %2428, %v2703_v33  }
  0xe2   :  { %v2886_v22 = vpop.permute.xlu1 %315  ;;  %v2888_v30 = vpop.permute.xlu0 %491 }
  0xe3   :  { %3899 = vst [vmem:[#allocation33_spill] sm:$0xff] %v2888_v30  ;;  %v858_v30 = vld [vmem:[%s3833_s2 + $0xa0] sm:$0xff] }
  0xe4   :  { %2402 = vset.pattern.permute.xlu1 %v3888_v13 }
  0xe5   :  { %731 = vperm.xlu1 %2402, %v2654_v26   ;;  %872 = vperm.xlu0 %2428, %v838_v9   ;;  %v840_v9 = vld [vmem:[%s3833_s2 + $0x10] sm:$0xff] }
  0xe6   :  { %v2895_v14 = vpop.permute.xlu1 %323  ;;  %v2897_v10 = vpop.permute.xlu0 %559 }
  0xe9   :  { %2403 = vset.pattern.permute.xlu1 %v3893_v50  ;;  %967 = vperm.xlu0 %2428, %v857_v24  }
  0xea   :  { %v2906_v46 = vpop.permute.xlu1 %331  ;;  %972 = vperm.xlu1 %2403, %v858_v30   ;;  %v2908_v26 = vpop.permute.xlu0 %499  ;;  %v842_v30 = vld [vmem:[%s3833_s2 + $0x20] sm:$0xff] }
  0xed   :  { %882 = vperm.xlu0 %2428, %v840_v9   ;;  %v861_v9 = vld [vmem:[%s3833_s2 + $0xb8] sm:$0xff] }
  0xee   :  { %v2916_v4 = vpop.permute.xlu1 %339  ;;  %977 = vperm.xlu1 %2403, %v859_v32   ;;  %v2918_v1 = vpop.permute.xlu0 %567  ;;  %v843_v32 = vld [vmem:[%s3833_s2 + $0x28] sm:$0xff] }
  0xef   :  { %3900 = vst [vmem:[#allocation34_spill] sm:$0xff] %v2916_v4  ;;  %3901 = vst [vmem:[#allocation35_spill] sm:$0xff] %v2918_v1 }
  0xf1   :  { %892 = vperm.xlu0 %2428, %v842_v30   ;;  %v844_v30 = vld [vmem:[%s3833_s2 + $0x30] sm:$0xff] }
  0xf2   :  { %v2923_v24 = vpop.permute.xlu1 %347  ;;  %2404 = vset.pattern.permute.xlu1 %v3888_v13  ;;  %v2926_v45 = vpop.permute.xlu0 %507 }
  0xf3   :  { %3902 = vst [vmem:[#allocation36_spill] sm:$0xff] %v2923_v24  ;;  %3903 = vst [vmem:[#allocation37_spill] sm:$0xff] %v2926_v45  ;;  %671 = vperm.xlu1 %2404, %v2523_v6   ;;  %v863_v6 = vld [vmem:[%s3833_s2 + $0xc8] sm:$0xff] }
  0xf5   :  { %987 = vperm.xlu0 %2428, %v861_v9  }
  0xf6   :  { %v2935_v1 = vpop.permute.xlu1 %355 }
  0xf7   :  { %2405 = vset.pattern.permute.xlu1 %v3893_v50  ;;  %v2941_v45 = vpop.permute.xlu0 %711 }
  0xf8   :  { %897 = vperm.xlu1 %2405, %v843_v32  }
  0xf9   :  { %902 = vperm.xlu0 %2428, %v844_v30   ;;  %v864_v30 = vld [vmem:[%s3833_s2 + $0xd0] sm:$0xff] }
  0xfa   :  { %v2943_v44 = vpop.permute.xlu1 %363 }
  0xfb   :  { %v2948_v9 = vpop.permute.xlu0 %719 }
  0xfc   :  { %3904 = vst [vmem:[#allocation38_spill] sm:$0xff] %v2948_v9  ;;  %2406 = vset.pattern.permute.xlu1 %v3897_v11 }
  0xfd   :  { %543 = vperm.xlu1 %2406, %v2710_v34   ;;  %997 = vperm.xlu0 %2428, %v863_v6   ;;  %v214_v34 = vlaneseq  ;;  %v850_v6 = vld [vmem:[%s3833_s2 + $0x60] sm:$0xff] }
  0xff   :  { %v2955_v5 = vpop.permute.xlu1 %515  ;;  %v2957_v32 = vpop.permute.xlu0 %651  ;;  %v215_v43 = vshrl.u32 %v214_v34, 7  ;;  %v860_v34 = vld [vmem:[%s3833_s2 + $0xb0] sm:$0xff] }
 0x100   :  { %3905 = vst [vmem:[#allocation39_spill] sm:$0xff] %v2957_v32 }
 0x101   :  { %479 = vperm.xlu1 %2406, %v2649_v25   ;;  %912 = vperm.xlu0 %2428, %v846_v3   ;;  %v380_v4 = vsub.s32 1, %v215_v43 }
 0x103   :  { %v2963_v0 = vpop.permute.xlu1 %447  ;;  %v2965_v63 = vpop.permute.xlu0 %723 }
 0x104   :  { %3906 = vst [vmem:[#allocation40_spill] sm:$0xff] %v2965_v63  ;;  %v772_v63 = vsub.s32 3, %v215_v43 }
 0x105   :  { %483 = vperm.xlu1 %2406, %v2530_v7   ;;  %1002 = vperm.xlu0 %2428, %v864_v30   ;;  %v216_v30 = vsub.s32 0, %v215_v43 }
 0x107   :  { %v2971_v23 = vpop.permute.xlu0 %735 }
 0x108   :  { %3907 = vst [vmem:[#allocation41_spill] sm:$0xff] %v2971_v23  ;;  %v2973_v3 = vpop.permute.xlu1 %707  ;;  %v853_v23 = vld [vmem:[%s3833_s2 + $0x78] sm:$0xff] }
 0x109   :  { %2407 = vset.pattern.permute.xlu1 %v3888_v13  ;;  %932 = vperm.xlu0 %2428, %v850_v6   ;;  %v21_v6 = vld [vmem:[%s3831_s0] sm:$0xf] }
 0x10a   :  { %743 = vperm.xlu1 %2407, %v2586_v15   ;;  %v576_v15 = vsub.s32 2, %v215_v43  ;;  %v2996_v29 = vrot.slane %v21_v6, %v216_v30  ;;  %v2998_v18 = vrot.slane %v21_v6, %v380_v4 }
 0x10b   :  { %v2980_v2 = vpop.permute.xlu0 %667 }
 0x10c   :  { %v2982_v24 = vpop.permute.xlu1 %643  ;;  %v395_v32 = vmul.f32 %v2998_v18, %v2761_v49  ;;  %v3006_v51 = vrot.slane %v21_v6, %v576_v15  ;;  %v845_v15 = vld [vmem:[%s3833_s2 + $0x38] sm:$0xff] }
 0x10d   :  { %3908 = vst [vmem:[#allocation42_spill] sm:$0xff] %v2982_v24  ;;  %1027 = vperm.xlu0 %2428, %v869_v42   ;;  %v231_v42 = vmul.f32 %v2996_v29, %v2759_v48 }
 0x10e   :  { %2408 = vset.pattern.permute.xlu1 %v3893_v50  ;;  %v591_v4 = vmul.f32 %v3006_v51, %v2908_v26 }
 0x10f   :  { %982 = vperm.xlu1 %2408, %v860_v34   ;;  %v2994_v61 = vpop.permute.xlu0 %739 }
 0x110   :  { %3909 = vst [vmem:[#allocation43_spill] sm:$0xff] %v2994_v61  ;;  %v3000_v60 = vpop.permute.xlu1 %647  ;;  %v3016_v61 = vrot.slane %v21_v6, %v772_v63 }
 0x111   :  { %947 = vperm.xlu0 %2428, %v853_v23   ;;  %v427_v23 = vadd.f32 %v395_v32, %v231_v42 }
 0x113   :  { %2409 = vset.pattern.permute.xlu1 %v3888_v13  ;;  %v3009_v34 = vpop.permute.xlu0 %747  ;;  %v623_v9 = vadd.f32 %v591_v4, %v427_v23  ;;  %v3915_v4 = vmov 1  }
 0x114   :  { %675 = vperm.xlu1 %2409, %v2649_v25  }
 0x115   :  { %v3014_v30 = vpop.permute.xlu1 %523 }
 0x116   :  { %3910 = vst [vmem:[#allocation44_spill] sm:$0xff] %v3014_v30 }
 0x117   :  { %v696_v48 = vpop.permute.xlu0 %695 }
 0x118   :  { %v787_v49 = vmul.f32 %v3016_v61, %v696_v48  ;;  %679 = vperm.xlu1 %2409, %v2530_v7  }
 0x119   :  { %v3020_v43 = vpop.permute.xlu1 %455 }
 0x11a   :  { %3911 = vst [vmem:[#allocation45_spill] sm:$0xff] %v3020_v43  ;;  %v3025_v26 = vadd.f32 %v787_v49, %v623_v9  ;;  %v595_v43 = vmul.f32 %v3006_v51, %v2955_v5 }
 0x11b   :  { %v3027_v25 = vpop.permute.xlu0 %767 }
 0x11c   :  { %3912 = vst [vmem:[#allocation46_spill] sm:$0xff] %v3025_v26  ;;  %3913 = vst [vmem:[#allocation47_spill] sm:$0xff] %v3027_v25  ;;  %2410 = vset.pattern.permute.xlu1 %v3893_v50  ;;  %v862_v26 = vld [vmem:[%s3833_s2 + $0xc0] sm:$0xff] }
 0x11d   :  { %907 = vperm.xlu1 %2410, %v845_v15  }
 0x11e   :  { %v3030_v63 = vpop.permute.xlu1 %715 }
 0x11f   :  { %v3032_v32 = vpop.permute.xlu0 %699 }
 0x120   :  { %3914 = vst [vmem:[#allocation48_spill] sm:$0xff] %v3032_v32  ;;  %v235_v32 = vmul.f32 %v2996_v29, %v2772_v52  ;;  %v791_v52 = vmul.f32 %v3016_v61, %v2941_v45 }
 0x121   :  { %2411 = vset.pattern.permute.xlu1 %v3897_v11 }
 0x122   :  { %555 = vperm.xlu1 %2411, %v2593_v16  }
 0x123   :  { %v953_v7 = vpop.permute.xlu1 %952 }
 0x124   :  { %v3036_v6 = vpop.permute.xlu0 %56 }
 0x126   :  { %487 = vperm.xlu1 %2411, %v2661_v27  }
 0x127   :  { %v958_v9 = vpop.permute.xlu1 %957 }
 0x128   :  { %v62_v42 = vpop.permute.xlu0 %61 }
 0x12a   :  { %2412 = vset.pattern.permute.xlu1 %v3915_v4 }
 0x12b   :  { %367 = vperm.xlu1 %2412, %v2600_v17  }
 0x12c   :  { %v3041_v23 = vpop.permute.xlu1 %655  ;;  %v3043_v48 = vpop.permute.xlu0 %76 }
 0x12d   :  { %3916 = vst [vmem:[#allocation49_spill] sm:$0xff] %v3043_v48  ;;  %v399_v48 = vmul.f32 %v2998_v18, %v2774_v53 }
 0x12f   :  { %2413 = vset.pattern.permute.xlu1 %v3888_v13  ;;  %v431_v20 = vadd.f32 %v399_v48, %v235_v32  ;;  %v847_v32 = vld [vmem:[%s3833_s2 + $0x48] sm:$0xff]  ;;  %v219_v48 = vmul.f32 %v2996_v29, %v62_v42  ;;  %v594_v42 = vmul.f32 %v3006_v51, %v2826_v12 }
 0x130   :  { %751 = vperm.xlu1 %2413, %v2593_v16   ;;  %v3047_v49 = vpop.permute.xlu0 %86 }
 0x131   :  { %v3049_v15 = vpop.permute.xlu1 %877  ;;  %v627_v30 = vadd.f32 %v595_v43, %v431_v20 }
 0x133   :  { %v823_v5 = vadd.f32 %v791_v52, %v627_v30  ;;  %v398_v30 = vmul.f32 %v2998_v18, %v2886_v22  ;;  %v790_v22 = vmul.f32 %v3016_v61, %v2973_v3 }
 0x134   :  { %2414 = vset.pattern.permute.xlu1 %v3893_v50  ;;  %v3055_v25 = vpop.permute.xlu0 %96 }
 0x135   :  { %3917 = vst [vmem:[#allocation50_spill] sm:$0xff] %v3055_v25  ;;  %992 = vperm.xlu1 %2414, %v862_v26  }
 0x136   :  { %v3061_v16 = vpop.permute.xlu1 %527 }
 0x137   :  { %3918 = vst [vmem:[#allocation51_spill] sm:$0xff] %v3061_v16 }
 0x138   :  { %v3065_v24 = vpop.permute.xlu0 %106 }
 0x139   :  { %3919 = vst [vmem:[#allocation52_spill] sm:$0xff] %v3065_v24  ;;  %2415 = vset.pattern.permute.xlu1 %v3888_v13 }
 0x13a   :  { %683 = vperm.xlu1 %2415, %v2661_v27   ;;  %v3069_v25 = vpop.permute.xlu1 %463  ;;  %v1047_v27 = vadd.f32 %v958_v9, %v823_v5  ;;  %v579_v9 = vmul.f32 %v3006_v51, %v2832_v54  ;;  %v775_v54 = vmul.f32 %v3016_v61, %v3000_v60  ;;  %v385_v60 = vmul.f32 %v2998_v18, %v2730_v39 }
 0x13c   :  { %v3073_v53 = vpop.permute.xlu0 %116  ;;  %v1079_v43 = vmax.f32 %v1047_v27, 0.0 }
 0x13d   :  { %3920 = vst [vmem:[#allocation53_spill] sm:$0xff] %v3073_v53 }
 0x13e   :  { %687 = vperm.xlu1 %2415, %v2537_v8   ;;  %v3076_v26 = vpop.permute.xlu1 %467  ;;  %v383_v8 = vmul.f32 %v2998_v18, %v2830_v21  ;;  %v1154_v27 = vand.u32 4294901760, %v1079_v43 }
 0x140   :  { %v3078_v16 = vpop.permute.xlu0 %126  ;;  %v415_v5 = vadd.f32 %v383_v8, %v219_v48  ;;  %v3107_v48 = vsub.f32 %v1079_v43, %v1154_v27  ;;  %v400_v43 = vmul.f32 %v2998_v18, %v2895_v14  ;;  %v237_v14 = vmul.f32 %v2996_v29, %v2781_v55 }
 0x141   :  { %3921 = vst [vmem:[#allocation54_spill] sm:$0xff] %v3078_v16  ;;  %v384_v55 = vmul.f32 %v2998_v18, %v2837_v57 }
 0x142   :  { %2416 = vset.pattern.permute.xlu1 %v3893_v50  ;;  %v611_v16 = vadd.f32 %v579_v9, %v415_v5  ;;  %v220_v9 = vmul.f32 %v2996_v29, %v2722_v36  ;;  %v221_v5 = vmul.f32 %v2996_v29, %v2728_v38  ;;  %v1336_v39 = vand.u32 4294901760, %v3107_v48 }
 0x143   :  { %917 = vperm.xlu1 %2416, %v847_v32   ;;  %v3085_v20 = vpop.permute.xlu1 %727 }
 0x144   :  { %v137_v45 = vpop.permute.xlu0 %136 }
 0x145   :  { %v234_v52 = vmul.f32 %v2996_v29, %v137_v45 }
 0x147   :  { %v430_v32 = vadd.f32 %v398_v30, %v234_v52  ;;  %2417 = vset.pattern.permute.xlu1 %v3897_v11  ;;  %v807_v52 = vadd.f32 %v775_v54, %v611_v16 }
 0x148   :  { %563 = vperm.xlu1 %2417, %v2600_v17   ;;  %v3098_v21 = vpop.permute.xlu1 %962  ;;  %v147_v53 = vpop.permute.xlu0 %146 }
 0x149   :  { %v626_v45 = vadd.f32 %v594_v42, %v430_v32  ;;  %v236_v11 = vmul.f32 %v2996_v29, %v147_v53  ;;  %v1031_v16 = vadd.f32 %v3049_v15, %v807_v52  ;;  %v417_v15 = vadd.f32 %v385_v60, %v221_v5 }
 0x14a   :  { %v218_v52 = vmul.f32 %v2996_v29, %v3036_v6  ;;  %v3172_v60 = vadd.f32 %v384_v55, %v220_v9  ;;  %v777_v9 = vmul.f32 %v3016_v61, %v3041_v23  ;;  %v606_v55 = vmul.f32 %v3006_v51, %v2897_v10 }
 0x14b   :  { %v822_v24 = vadd.f32 %v790_v22, %v626_v45  ;;  %v432_v53 = vadd.f32 %v400_v43, %v236_v11  ;;  %v382_v22 = vmul.f32 %v2998_v18, %v2724_v37  ;;  %v581_v11 = vmul.f32 %v3006_v51, %v2848_v35 }
 0x14c   :  { %495 = vperm.xlu1 %2417, %v2668_v28   ;;  %v3105_v12 = vpop.permute.xlu0 %156  ;;  %v1337_v37 = vsub.f32 %v3107_v48, %v1336_v39  ;;  %v1063_v45 = vmax.f32 %v1031_v16, 0.0  ;;  %v224_v23 = vmul.f32 %v2996_v29, %v3047_v49  ;;  %v578_v10 = vmul.f32 %v3006_v51, %v2963_v0 }
 0x14d   :  { %v3109_v8 = vpop.permute.xlu1 %659  ;;  %v1046_v30 = vadd.f32 %v953_v7, %v822_v24  ;;  %v223_v24 = vmul.f32 %v2996_v29, %v2734_v40  ;;  %v387_v7 = vmul.f32 %v2998_v18, %v2737_v41  ;;  %v239_v40 = vmul.f32 %v2996_v29, %v2789_v58 }
 0x14e   :  { %v613_v43 = vadd.f32 %v581_v11, %v417_v15  ;;  %v3185_v16 = vand.u32 4294901760, %v1063_v45  ;;  %v780_v49 = vmul.f32 %v3016_v61, %v2980_v2 }
 0x14f   :  { %v1078_v3 = vmax.f32 %v1046_v30, 0.0 }
 0x150   :  { %2418 = vset.pattern.permute.xlu1 %v3915_v4  ;;  %v3121_v42 = vpop.permute.xlu0 %166  ;;  %v401_v4 = vmul.f32 %v2998_v18, %v2784_v56  ;;  %v596_v56 = vmul.f32 %v3006_v51, %v2839_v62  ;;  %v809_v15 = vadd.f32 %v777_v9, %v613_v43  ;;  %v3924_v43 = vld [vmem:[#allocation24_spill] sm:$0xff] }
 0x151   :  { %371 = vperm.xlu1 %2418, %v2703_v33   ;;  %v3128_v36 = vpop.permute.xlu1 %663  ;;  %v1151_v38 = vand.u32 4294901760, %v1078_v3  ;;  %v403_v33 = vmul.f32 %v2998_v18, %v2792_v59 }
 0x152   :  { %v3162_v62 = vadd.f32 %v401_v4, %v237_v14  ;;  %v628_v35 = vadd.f32 %v596_v56, %v432_v53  ;;  %v1338_v4 = vand.u32 4294901760, %v1337_v37  ;;  %v414_v53 = vadd.f32 %v382_v22, %v218_v52  ;;  %v3923_v37 = vld [vmem:[#allocation44_spill] sm:$0xff] }
 0x153   :  { %v3140_v41 = vpack.c.bf16 %v1154_v27, %v1151_v38  ;;  %v3142_v32 = vsub.f32 %v1078_v3, %v1151_v38  ;;  %v3160_v27 = vadd.f32 %v387_v7, %v223_v24  ;;  %v3165_v30 = vadd.f32 %v403_v33, %v239_v40 }
 0x154   :  { %v3152_v58 = vpop.permute.xlu0 %176  ;;  %v388_v24 = vmul.f32 %v2998_v18, %v2852_v19  ;;  %v792_v7 = vmul.f32 %v3016_v61, %v3030_v63  ;;  %v408_v38 = vmul.f32 %v2998_v18, %v2935_v1  ;;  %v800_v63 = vmul.f32 %v3016_v61, %v3009_v34  ;;  %v865_v34 = vld [vmem:[%s3833_s2 + $0xd8] sm:$0xff] }
 0x155   :  { %2420 = vset.pattern.permute.xlu1 %v3888_v13  ;;  %2190 = vmatprep.subr.bf16.mxu0 %v3140_v41  ;;  %v1329_v59 = vand.u32 4294901760, %v3142_v32  ;;  %v410_v22 = vmul.f32 %v2998_v18, %v2943_v44  ;;  %v597_v44 = vmul.f32 %v3006_v51, %v3923_v37  ;;  %v610_v52 = vadd.f32 %v578_v10, %v414_v53  ;;  %v3932_v37 = vld [vmem:[#allocation39_spill] sm:$0xff] }
 0x156   :  { %755 = vperm.xlu1 %2420, %v2689_v31   ;;  %v888_v54 = vpop.permute.xlu1 %887  ;;  %v824_v19 = vadd.f32 %v792_v7, %v628_v35  ;;  %v420_v7 = vadd.f32 %v388_v24, %v224_v23  ;;  %v3929_v23 = vld [vmem:[#allocation49_spill] sm:$0xff] }
 0x157   :  { %v1330_v3 = vsub.f32 %v3142_v32, %v1329_v59  ;;  %v3170_v5 = vpack.c.bf16 %v1336_v39, %v1329_v59  ;;  %v604_v39 = vmul.f32 %v3006_v51, %v2882_v47  ;;  %v402_v47 = vmul.f32 %v2998_v18, %v2906_v46 }
 0x158   :  { %v187_v31 = vpop.permute.xlu0 %186  ;;  %v1048_v59 = vadd.f32 %v3098_v21, %v824_v19  ;;  %v1033_v2 = vadd.f32 %v888_v54, %v809_v15  ;;  %v3925_v21 = vld [vmem:[#allocation42_spill] sm:$0xff]  ;;  %v3927_v19 = vld [vmem:[#allocation51_spill] sm:$0xff] }
 0x159   :  { %3922 = vst [vmem:[#allocation55_spill] sm:$0xff] %v3170_v5  ;;  %v244_v14 = vmul.f32 %v2996_v29, %v187_v31  ;;  %v1331_v6 = vand.u32 4294901760, %v1330_v3  ;;  %v598_v24 = vmul.f32 %v3006_v51, %v3927_v19  ;;  %v3973_v5 = vld [vmem:[#allocation12_spill] sm:$0xff] }
 0x15a   :  { %759 = vperm.xlu1 %2420, %v2600_v17   ;;  %v238_v17 = vmul.f32 %v2996_v29, %v3105_v12  ;;  %v3211_v12 = vsub.f32 %v1063_v45, %v3185_v16  ;;  %v1080_v54 = vmax.f32 %v1048_v59, 0.0  ;;  %v3931_v59 = vld [vmem:[#allocation25_spill] sm:$0xff] }
 0x15b   :  { %v440_v1 = vadd.f32 %v408_v38, %v244_v14  ;;  %v3190_v40 = vpop.permute.xlu1 %539  ;;  %v2221_v33 = vpack.c.bf16 %v1338_v4, %v1331_v6  ;;  %v386_v14 = vmul.f32 %v2998_v18, %v3924_v43  ;;  %v774_v6 = vmul.f32 %v3016_v61, %v3925_v21  ;;  %v3926_v4 = vld [vmem:[#allocation45_spill] sm:$0xff] }
 0x15c   :  { %v197_v56 = vpop.permute.xlu0 %196  ;;  %v434_v31 = vadd.f32 %v402_v47, %v238_v17  ;;  %v1224_v53 = vand.u32 4294901760, %v3211_v12  ;;  %v629_v47 = vadd.f32 %v597_v44, %v3162_v62  ;;  %v222_v17 = vmul.f32 %v2996_v29, %v3929_v23 }
 0x15d   :  { %v246_v11 = vmul.f32 %v2996_v29, %v197_v56  ;;  %2222 = vmatprep.subr.bf16.mxu1 %v2221_v33  ;;  %v636_v46 = vadd.f32 %v604_v39, %v440_v1  ;;  %v580_v39 = vmul.f32 %v3006_v51, %v3926_v4  ;;  %v3928_v1 = vld [vmem:[#allocation38_spill] sm:$0xff]  ;;  %v806_v56 = vadd.f32 %v774_v6, %v610_v52  ;;  %v3933_v52 = vld [vmem:[#allocation15_spill] sm:$0xff] }
 0x15e   :  { %2421 = vset.pattern.permute.xlu1 %v3893_v50  ;;  %v793_v33 = vmul.f32 %v3016_v61, %v3928_v1  ;;  %v599_v62 = vmul.f32 %v3006_v51, %v3931_v59  ;;  %v776_v44 = vmul.f32 %v3016_v61, %v3932_v37  ;;  %v795_v6 = vmul.f32 %v3016_v61, %v3085_v20  ;;  %v849_v20 = vld [vmem:[%s3833_s2 + $0x58] sm:$0xff] }
 0x15f   :  { %v442_v35 = vadd.f32 %v410_v22, %v246_v11  ;;  %1007 = vperm.xlu1 %2421, %v865_v34   ;;  %v472_v0 = vpop.permute.xlu1 %471  ;;  %v3217_v3 = vadd.f32 %v800_v63, %v636_v46  ;;  %v1065_v22 = vmax.f32 %v1033_v2, 0.0  ;;  %v630_v46 = vadd.f32 %v598_v24, %v434_v31 }
 0x160   :  { %v584_v45 = vmul.f32 %v3006_v51, %v472_v0  ;;  %v3220_v38 = vpop.permute.xlu0 %206  ;;  %v1157_v31 = vand.u32 4294901760, %v1080_v54  ;;  %v3263_v2 = vsub.f32 %v3211_v12, %v1224_v53  ;;  %v825_v21 = vadd.f32 %v793_v33, %v629_v47 }
 0x161   :  { %v3228_v9 = vadd.f32 %v606_v55, %v442_v35  ;;  %v3930_v55 = vld [vmem:[#allocation40_spill] sm:$0xff]  ;;  %v612_v35 = vadd.f32 %v580_v39, %v3172_v60  ;;  %v583_v60 = vmul.f32 %v3006_v51, %v3076_v26  ;;  %v1112_v4 = vand.u32 4294901760, %v1065_v22 }
 0x162   :  { %v616_v63 = vadd.f32 %v584_v45, %v420_v7  ;;  %v794_v34 = vmul.f32 %v3016_v61, %v3930_v55  ;;  %v3253_v7 = vmul.f32 %v2996_v29, %v3933_v52  ;;  %v418_v45 = vadd.f32 %v386_v14, %v222_v17 }
 0x163   :  { %2422 = vset.pattern.permute.xlu1 %v3888_v13  ;;  %v631_v24 = vadd.f32 %v599_v62, %v3165_v30  ;;  %v808_v26 = vadd.f32 %v776_v44, %v612_v35  ;;  %v3276_v47 = vsub.f32 %v1080_v54, %v1157_v31  ;;  %v615_v17 = vadd.f32 %v583_v60, %v3160_v27 }
 0x164   :  { %691 = vperm.xlu1 %2422, %v2668_v28   ;;  %v3242_v10 = vpop.permute.xlu1 %731  ;;  %v873_v11 = vpop.permute.xlu0 %872  ;;  %v3244_v15 = vadd.f32 %v780_v49, %v616_v63  ;;  %v582_v28 = vmul.f32 %v3006_v51, %v3069_v25  ;;  %v848_v49 = vld [vmem:[%s3833_s2 + $0x50] sm:$0xff]  ;;  %v778_v25 = vmul.f32 %v3016_v61, %v3109_v8  ;;  %v826_v19 = vadd.f32 %v794_v34, %v630_v46 }
 0x165   :  { %v1030_v0 = vadd.f32 %v873_v11, %v806_v56  ;;  %v1226_v8 = vand.u32 4294901760, %v3263_v2  ;;  %v3285_v34 = vsub.f32 %v1065_v22, %v1112_v4  ;;  %v827_v59 = vadd.f32 %v795_v6, %v631_v24 }
 0x166   :  { %v614_v23 = vadd.f32 %v582_v28, %v418_v45  ;;  %v1343_v52 = vand.u32 4294901760, %v3276_v47  ;;  %v3935_v24 = vmov 2  }
 0x167   :  { %v1062_v43 = vmax.f32 %v1030_v0, 0.0  ;;  %v1238_v60 = vand.u32 4294901760, %v3285_v34 }
 0x168   :  { %2423 = vset.pattern.permute.xlu1 %v3893_v50  ;;  %v968_v39 = vpop.permute.xlu0 %967  ;;  %v810_v62 = vadd.f32 %v778_v25, %v614_v23  ;;  %v1344_v23 = vsub.f32 %v3276_v47, %v1343_v52 }
 0x169   :  { %v1103_v63 = vand.u32 4294901760, %v1062_v43  ;;  %v1049_v14 = vadd.f32 %v968_v39, %v825_v21  ;;  %922 = vperm.xlu1 %2423, %v848_v49   ;;  %v973_v1 = vpop.permute.xlu1 %972 }
 0x16a   :  { %v1050_v33 = vadd.f32 %v973_v1, %v826_v19  ;;  %v3936_v1 = vld [vmem:[#allocation5_spill] sm:$0xff] }
 0x16b   :  { %v3280_v56 = vsub.f32 %v1062_v43, %v1103_v63  ;;  %v1081_v30 = vmax.f32 %v1049_v14, 0.0  ;;  %v3283_v55 = vpack.c.bf16 %v3185_v16, %v1103_v63  ;;  %v779_v16 = vmul.f32 %v3016_v61, %v3128_v36 }
 0x16c   :  { %v1082_v11 = vmax.f32 %v1050_v33, 0.0  ;;  %v883_v46 = vpop.permute.xlu0 %882 }
 0x16d   :  { %v1160_v37 = vand.u32 4294901760, %v1081_v30  ;;  %v1032_v44 = vadd.f32 %v883_v46, %v808_v26  ;;  %927 = vperm.xlu1 %2423, %v849_v20   ;;  %v978_v54 = vpop.permute.xlu1 %977  ;;  %2192 = vmatpush3.bf16.msra.mxu0 %v3283_v55  ;;  %v1217_v27 = vand.u32 4294901760, %v3280_v56 }
 0x16e   :  { %v1163_v22 = vand.u32 4294901760, %v1082_v11  ;;  %v1051_v0 = vadd.f32 %v978_v54, %v827_v59 }
 0x16f   :  { %v3294_v28 = vsub.f32 %v1081_v30, %v1160_v37  ;;  %v1064_v49 = vmax.f32 %v1032_v44, 0.0  ;;  %v3296_v2 = vpack.c.bf16 %v1160_v37, %v1157_v31  ;;  %v1218_v45 = vsub.f32 %v3280_v56, %v1217_v27 }
 0x170   :  { %v3300_v43 = vsub.f32 %v1082_v11, %v1163_v22  ;;  %v1083_v21 = vmax.f32 %v1051_v0, 0.0  ;;  %v893_v6 = vpop.permute.xlu0 %892  ;;  %v3304_v36 = vpack.c.bf16 %v1224_v53, %v1217_v27  ;;  %v811_v11 = vadd.f32 %v779_v16, %v615_v17  ;;  %v3937_v17 = vld [vmem:[#allocation6_spill] sm:$0xff] }
 0x171   :  { %v1350_v25 = vand.u32 4294901760, %v3294_v28  ;;  %v1109_v39 = vand.u32 4294901760, %v1064_v49  ;;  %v1034_v19 = vadd.f32 %v893_v6, %v810_v62  ;;  %2424 = vset.pattern.permute.xlu1 %v3935_v24  ;;  %2194 = vmatprep.subr.bf16.mxu0 %v3296_v2  ;;  %v1219_v31 = vand.u32 4294901760, %v1218_v45 }
 0x172   :  { %3934 = vst [vmem:[#allocation44_spill] sm:$0xff] %v3304_v36  ;;  %v1357_v63 = vand.u32 4294901760, %v3300_v43  ;;  %v1166_v14 = vand.u32 4294901760, %v1083_v21  ;;  %571 = vperm.xlu1 %2424, %v3936_v1   ;;  %v3311_v26 = vpop.permute.xlu1 %671  ;;  %v1239_v27 = vsub.f32 %v3285_v34, %v1238_v60  ;;  %v1345_v16 = vand.u32 4294901760, %v1344_v23 }
 0x173   :  { %v3316_v33 = vsub.f32 %v1064_v49, %v1109_v39  ;;  %v1066_v20 = vmax.f32 %v1034_v19, 0.0  ;;  %v3318_v30 = vpack.c.bf16 %v1112_v4, %v1109_v39  ;;  %v2223_v59 = vpack.c.bf16 %v1226_v8, %v1219_v31  ;;  %v3938_v49 = vld [vmem:[#allocation16_spill] sm:$0xff] }
 0x174   :  { %v3320_v46 = vsub.f32 %v1083_v21, %v1166_v14  ;;  %v3322_v62 = vpack.c.bf16 %v1166_v14, %v1163_v22  ;;  %v1351_v37 = vsub.f32 %v3294_v28, %v1350_v25  ;;  %v1358_v0 = vsub.f32 %v3300_v43, %v1357_v63  ;;  %v3954_v22 = vld [vmem:[#allocation17_spill] sm:$0xff] }
 0x175   :  { %v1231_v44 = vand.u32 4294901760, %v3316_v33  ;;  %v1115_v54 = vand.u32 4294901760, %v1066_v20  ;;  %2196 = vmatpush3.bf16.msra.mxu0 %v3318_v30  ;;  %2224 = vmatpush3.bf16.msra.mxu1 %v2223_v59  ;;  %v405_v45 = vmul.f32 %v2998_v18, %v3938_v49  ;;  %v242_v21 = vmul.f32 %v2996_v29, %v3152_v58 }
 0x176   :  { %v1364_v4 = vand.u32 4294901760, %v3320_v46  ;;  %503 = vperm.xlu1 %2424, %v3937_v17   ;;  %v1352_v8 = vand.u32 4294901760, %v1351_v37  ;;  %2198 = vmatprep.subr.bf16.mxu0 %v3322_v62  ;;  %v601_v23 = vmul.f32 %v3006_v51, %v3190_v40  ;;  %v1240_v37 = vand.u32 4294901760, %v1239_v27  ;;  %v2431_v40 = vld [vmem:[%s3832_s1 + $0xf0] sm:$0xff] }
 0x177   :  { %v3337_v6 = vsub.f32 %v1066_v20, %v1115_v54  ;;  %v898_v39 = vpop.permute.xlu1 %897  ;;  %v1232_v19 = vsub.f32 %v3316_v33, %v1231_v44  ;;  %v1359_v58 = vand.u32 4294901760, %v1358_v0  ;;  %v3347_v49 = vpack.c.bf16 %v1350_v25, %v1343_v52 }
 0x178   :  { %v1035_v24 = vadd.f32 %v898_v39, %v811_v11  ;;  %v2225_v31 = vpack.c.bf16 %v1352_v8, %v1345_v16  ;;  %v1365_v14 = vsub.f32 %v3320_v46, %v1364_v4  ;;  %v3349_v11 = vpack.c.bf16 %v1238_v60, %v1231_v44  ;;  %v3941_v8 = vld [vmem:[#allocation36_spill] sm:$0xff]  ;;  %v3943_v60 = vld [vmem:[#allocation41_spill] sm:$0xff] }
 0x179   :  { %v1233_v59 = vand.u32 4294901760, %v1232_v19  ;;  %3939 = vst [vmem:[#allocation24_spill] sm:$0xff] %v3347_v49  ;;  %v437_v16 = vadd.f32 %v405_v45, %v3253_v7  ;;  %v406_v39 = vmul.f32 %v2998_v18, %v3941_v8  ;;  %v1245_v0 = vand.u32 4294901760, %v3337_v6  ;;  %v867_v8 = vld [vmem:[%s3833_s2 + $0xe8] sm:$0xff] }
 0x17a   :  { %v1067_v20 = vmax.f32 %v1035_v24, 0.0  ;;  %2226 = vmatprep.subr.bf16.mxu1 %v2225_v31  ;;  %2426 = vset.pattern.permute.xlu1 %v3888_v13  ;;  %v1366_v17 = vand.u32 4294901760, %v1365_v14  ;;  %3940 = vst [vmem:[#allocation42_spill] sm:$0xff] %v3349_v11  ;;  %v3358_v52 = vpack.c.bf16 %v1364_v4, %v1357_v63  ;;  %v797_v25 = vmul.f32 %v3016_v61, %v3943_v60  ;;  %v866_v14 = vld [vmem:[%s3833_s2 + $0xe0] sm:$0xff] }
 0x17b   :  { %763 = vperm.xlu1 %2426, %v2431_v40   ;;  %v2227_v27 = vpack.c.bf16 %v1240_v37, %v1233_v59  ;;  %v438_v7 = vadd.f32 %v406_v39, %v242_v21  ;;  %v633_v44 = vadd.f32 %v601_v23, %v437_v16  ;;  %v988_v21 = vpop.permute.xlu0 %987 }
 0x17c   :  { %v1118_v19 = vand.u32 4294901760, %v1067_v20  ;;  %v544_v24 = vpop.permute.xlu1 %543  ;;  %v2229_v31 = vpack.c.bf16 %v1366_v17, %v1359_v58  ;;  %3942 = vst [vmem:[#allocation45_spill] sm:$0xff] %v3358_v52  ;;  %v3944_v58 = vld [vmem:[#allocation43_spill] sm:$0xff] }
 0x17d   :  { %v602_v45 = vmul.f32 %v3006_v51, %v544_v24  ;;  %2228 = vmatpush3.bf16.msra.mxu1 %v2227_v27  ;;  %v798_v63 = vmul.f32 %v3016_v61, %v3944_v58  ;;  %v829_v16 = vadd.f32 %v797_v25, %v633_v44  ;;  %v3946_v25 = vld [vmem:[#allocation34_spill] sm:$0xff] }
 0x17e   :  { %v3366_v59 = vsub.f32 %v1067_v20, %v1118_v19  ;;  %2230 = vmatprep.subr.bf16.mxu1 %v2229_v31  ;;  %v3368_v37 = vpack.c.bf16 %v1118_v19, %v1115_v54  ;;  %v1246_v20 = vsub.f32 %v3337_v6, %v1245_v0  ;;  %v240_v19 = vmul.f32 %v2996_v29, %v3121_v42 }
 0x17f   :  { %v634_v4 = vadd.f32 %v602_v45, %v438_v7  ;;  %2427 = vset.pattern.permute.xlu1 %v3893_v50  ;;  %v1053_v24 = vadd.f32 %v988_v21, %v829_v16  ;;  %v404_v44 = vmul.f32 %v2998_v18, %v3946_v25  ;;  %v796_v42 = vmul.f32 %v3016_v61, %v3242_v10  ;;  %v3948_v25 = vld [vmem:[#allocation7_spill] sm:$0xff] }
 0x180   :  { %v1252_v23 = vand.u32 4294901760, %v3366_v59  ;;  %1012 = vperm.xlu1 %2427, %v866_v14   ;;  %v3374_v17 = vpop.permute.xlu1 %479  ;;  %2200 = vmatpush3.bf16.msra.mxu0 %v3368_v37  ;;  %v1247_v60 = vand.u32 4294901760, %v1246_v20  ;;  %v851_v20 = vld [vmem:[%s3833_s2 + $0x68] sm:$0xff] }
 0x181   :  { %v3383_v39 = vadd.f32 %v798_v63, %v634_v4  ;;  %v436_v14 = vadd.f32 %v404_v44, %v240_v19  ;;  %v1085_v58 = vmax.f32 %v1053_v24, 0.0  ;;  %v2432_v4 = vld [vmem:[%s3832_s1 + $0x78] sm:$0xff]  ;;  %v868_v24 = vld [vmem:[%s3833_s2 + $0xf0] sm:$0xff]  ;;  %v225_v44 = vmul.f32 %v2996_v29, %v3948_v25 }
 0x182   :  { %v1253_v40 = vsub.f32 %v3366_v59, %v1252_v23  ;;  %v3386_v27 = vpack.c.bf16 %v1252_v23, %v1245_v0  ;;  %v3947_v0 = vld [vmem:[#allocation27_spill] sm:$0xff] }
 0x183   :  { %v600_v63 = vmul.f32 %v3006_v51, %v3947_v0  ;;  %v1172_v23 = vand.u32 4294901760, %v1085_v58 }
 0x184   :  { %3945 = vst [vmem:[#allocation51_spill] sm:$0xff] %v3386_v27  ;;  %1017 = vperm.xlu1 %2427, %v867_v8   ;;  %v3390_v31 = vpop.permute.xlu1 %483  ;;  %v1254_v7 = vand.u32 4294901760, %v1253_v40  ;;  %v903_v8 = vpop.permute.xlu0 %902 }
 0x185   :  { %v632_v16 = vadd.f32 %v600_v63, %v436_v14  ;;  %v3406_v19 = vsub.f32 %v1085_v58, %v1172_v23  ;;  %v852_v63 = vld [vmem:[%s3833_s2 + $0x70] sm:$0xff] }
 0x186   :  { %v2231_v45 = vpack.c.bf16 %v1254_v7, %v1247_v60  ;;  %v1036_v60 = vadd.f32 %v903_v8, %v3244_v15  ;;  %v781_v8 = vmul.f32 %v3016_v61, %v3311_v26  ;;  %v243_v26 = vmul.f32 %v2996_v29, %v3954_v22 }
 0x187   :  { %v1378_v14 = vand.u32 4294901760, %v3406_v19 }
 0x188   :  { %2429 = vset.pattern.permute.xlu1 %v3888_v13  ;;  %2232 = vmatpush3.bf16.msra.mxu1 %v2231_v45  ;;  %v828_v13 = vadd.f32 %v796_v42, %v632_v16  ;;  %v3949_v45 = vld [vmem:[#allocation8_spill] sm:$0xff]  ;;  %v3950_v42 = vld [vmem:[#allocation29_spill] sm:$0xff] }
 0x189   :  { %703 = vperm.xlu1 %2429, %v2432_v4   ;;  %v744_v21 = vpop.permute.xlu1 %743  ;;  %v585_v15 = vmul.f32 %v3006_v51, %v3950_v42  ;;  %v1068_v4 = vmax.f32 %v1036_v60, 0.0  ;;  %v1379_v60 = vsub.f32 %v3406_v19, %v1378_v14 }
 0x18b   :  { %v1380_v54 = vand.u32 4294901760, %v1379_v60 }
 0x18d   :  { %2430 = vset.pattern.permute.xlu1 %v3893_v50  ;;  %v389_v50 = vmul.f32 %v2998_v18, %v3949_v45 }
 0x18e   :  { %937 = vperm.xlu1 %2430, %v851_v20   ;;  %v983_v40 = vpop.permute.xlu1 %982 }
 0x18f   :  { %v1052_v10 = vadd.f32 %v983_v40, %v828_v13  ;;  %v421_v13 = vadd.f32 %v389_v50, %v225_v44  ;;  %v1095_v40 = vld [vmem:[%s3834_s3 + $0x8] sm:$0xff]  ;;  %v1121_v44 = vand.u32 4294901760, %v1068_v4 }
 0x191   :  { %v1084_v7 = vmax.f32 %v1052_v10, 0.0  ;;  %v617_v25 = vadd.f32 %v585_v15, %v421_v13  ;;  %v3955_v15 = vld [vmem:[#allocation18_spill] sm:$0xff]  ;;  %v3457_v35 = vsub.f32 %v1068_v4, %v1121_v44 }
 0x192   :  { %1022 = vperm.xlu1 %2430, %v868_v24   ;;  %v407_v13 = vmul.f32 %v2998_v18, %v3955_v15 }
 0x193   :  { %v1169_v0 = vand.u32 4294901760, %v1084_v7  ;;  %v3417_v58 = vpop.permute.xlu1 %675  ;;  %v1259_v22 = vand.u32 4294901760, %v3457_v35 }
 0x195   :  { %v3424_v20 = vsub.f32 %v1084_v7, %v1169_v0  ;;  %v3426_v16 = vpack.c.bf16 %v1172_v23, %v1169_v0  ;;  %v1096_v23 = vld [vmem:[%s3835_s4] sm:$0xff]  ;;  %v3441_v7 = vand.u32 4294901760, %v1095_v40 }
 0x196   :  { %942 = vperm.xlu1 %2430, %v852_v63   ;;  %v813_v63 = vadd.f32 %v781_v8, %v617_v25  ;;  %v3956_v8 = vld [vmem:[#allocation31_spill] sm:$0xff]  ;;  %v439_v25 = vadd.f32 %v407_v13, %v243_v26 }
 0x197   :  { %3951 = vst [vmem:[#allocation38_spill] sm:$0xff] %v3426_v16  ;;  %v1371_v10 = vand.u32 4294901760, %v3424_v20  ;;  %v3434_v24 = vpop.permute.xlu1 %679  ;;  %2202 = vmatprep.subr.bf16.mxu0 %v3426_v16  ;;  %3952 = vst [vmem:[#allocation49_spill] sm:$0xff] %v3441_v7  ;;  %v3447_v50 = vsub.f32 %v1095_v40, %v3441_v7  ;;  %1439 = vmatprep.mubr.f32.mxu1 %v3441_v7 }
 0x199   :  { %v1372_v45 = vsub.f32 %v3424_v20, %v1371_v10  ;;  %v3450_v0 = vpack.c.bf16 %v1378_v14, %v1371_v10  ;;  %v3848_v1 = vand.u32 4294901760, %v3447_v50  ;;  %v603_v10 = vmul.f32 %v3006_v51, %v3956_v8 }
 0x19a   :  { %1099 = vperm.xlu1 %2430, %v1096_v23  }
 0x19b   :  { %3953 = vst [vmem:[#allocation40_spill] sm:$0xff] %v3450_v0  ;;  %v1373_v42 = vand.u32 4294901760, %v1372_v45  ;;  %v1201_v14 = vsub.f32 %v3447_v50, %v3848_v1  ;;  %v799_v45 = vmul.f32 %v3016_v61, %v744_v21  ;;  %v586_v21 = vmul.f32 %v3006_v51, %v3374_v17  ;;  %v3961_v17 = vld [vmem:[#allocation9_spill] sm:$0xff] }
 0x19c   :  { %v908_v53 = vpop.permute.xlu1 %907 }
 0x19d   :  { %v1037_v40 = vadd.f32 %v908_v53, %v813_v63  ;;  %v2233_v57 = vpack.c.bf16 %v1380_v54, %v1373_v42  ;;  %v1202_v60 = vand.u32 4294901760, %v1201_v14  ;;  %v635_v53 = vadd.f32 %v603_v10, %v439_v25  ;;  %v998_v14 = vpop.permute.xlu0 %997  ;;  %v3959_v25 = vld [vmem:[#allocation50_spill] sm:$0xff] }
 0x19f   :  { %v1069_v23 = vmax.f32 %v1037_v40, 0.0  ;;  %2234 = vmatprep.subr.bf16.mxu1 %v2233_v57  ;;  %1203 = vmatprep.mubr.f32.mxu0 %v1202_v60  ;;  %v831_v42 = vadd.f32 %v799_v45, %v635_v53  ;;  %v1260_v57 = vsub.f32 %v3457_v35, %v1259_v22  ;;  %v226_v45 = vmul.f32 %v2996_v29, %v3959_v25  ;;  %v3960_v53 = vld [vmem:[#allocation26_spill] sm:$0xff] }
 0x1a0   :  { %v390_v1 = vmul.f32 %v2998_v18, %v3960_v53 }
 0x1a1   :  { %v1124_v15 = vand.u32 4294901760, %v1069_v23  ;;  %v3466_v4 = vpop.permute.xlu1 %555  ;;  %v1055_v10 = vadd.f32 %v998_v14, %v831_v42  ;;  %v782_v42 = vmul.f32 %v3016_v61, %v3417_v58  ;;  %v913_v25 = vpop.permute.xlu0 %912 }
 0x1a3   :  { %v3468_v54 = vsub.f32 %v1069_v23, %v1124_v15  ;;  %v3470_v63 = vpack.c.bf16 %v1124_v15, %v1121_v44  ;;  %v1261_v44 = vand.u32 4294901760, %v1260_v57  ;;  %v1087_v0 = vmax.f32 %v1055_v10, 0.0 }
 0x1a4   :  { %v227_v10 = vmul.f32 %v2996_v29, %v3961_v17 }
 0x1a5   :  { %3957 = vst [vmem:[#allocation25_spill] sm:$0xff] %v3470_v63  ;;  %v1266_v8 = vand.u32 4294901760, %v3468_v54  ;;  %v3473_v40 = vpop.permute.xlu1 %487  ;;  %2204 = vmatpush3.bf16.msra.mxu0 %v3470_v63 }
 0x1a7   :  { %v1267_v26 = vsub.f32 %v3468_v54, %v1266_v8  ;;  %v3480_v13 = vpack.c.bf16 %v1266_v8, %v1259_v22  ;;  %v422_v22 = vadd.f32 %v390_v1, %v226_v45  ;;  %v3962_v1 = vld [vmem:[#allocation10_spill] sm:$0xff] }
 0x1a8   :  { %v391_v45 = vmul.f32 %v2998_v18, %v3962_v1 }
 0x1a9   :  { %3958 = vst [vmem:[#allocation39_spill] sm:$0xff] %v3480_v13  ;;  %v1268_v23 = vand.u32 4294901760, %v1267_v26  ;;  %v618_v57 = vadd.f32 %v586_v21, %v422_v22  ;;  %v1178_v26 = vand.u32 4294901760, %v1087_v0  ;;  %v587_v22 = vmul.f32 %v3006_v51, %v3390_v31 }
 0x1aa   :  { %v3482_v60 = vpop.permute.xlu1 %367 }
 0x1ab   :  { %v2235_v15 = vpack.c.bf16 %v1268_v23, %v1261_v44  ;;  %v814_v14 = vadd.f32 %v782_v42, %v618_v57  ;;  %v3495_v23 = vsub.f32 %v1087_v0, %v1178_v26  ;;  %v423_v42 = vadd.f32 %v391_v45, %v227_v10 }
 0x1ac   :  { %v783_v57 = vmul.f32 %v3016_v61, %v3434_v24 }
 0x1ad   :  { %2236 = vmatpush3.bf16.msra.mxu1 %v2235_v15  ;;  %v1038_v53 = vadd.f32 %v913_v25, %v814_v14  ;;  %v1392_v21 = vand.u32 4294901760, %v3495_v23 }
 0x1af   :  { %v3492_v8 = vpop.permute.xlu1 %751  ;;  %v1393_v25 = vsub.f32 %v3495_v23, %v1392_v21 }
 0x1b1   :  { %v1394_v24 = vand.u32 4294901760, %v1393_v25 }
 0x1b4   :  { %v993_v13 = vpop.permute.xlu1 %992 }
 0x1b5   :  { %v1054_v44 = vadd.f32 %v993_v13, %v3383_v39  ;;  %v1070_v39 = vmax.f32 %v1038_v53, 0.0  ;;  %v619_v53 = vadd.f32 %v587_v22, %v423_v42 }
 0x1b7   :  { %v1086_v27 = vmax.f32 %v1054_v44, 0.0  ;;  %v815_v10 = vadd.f32 %v783_v57, %v619_v53 }
 0x1b9   :  { %v1175_v58 = vand.u32 4294901760, %v1086_v27  ;;  %v3501_v15 = vpop.permute.xlu1 %683 }
 0x1bb   :  { %v3506_v0 = vsub.f32 %v1086_v27, %v1175_v58  ;;  %v3508_v13 = vpack.c.bf16 %v1178_v26, %v1175_v58  ;;  %v1127_v26 = vand.u32 4294901760, %v1070_v39 }
 0x1bd   :  { %3963 = vst [vmem:[#allocation15_spill] sm:$0xff] %v3508_v13  ;;  %v1385_v14 = vand.u32 4294901760, %v3506_v0  ;;  %v3513_v44 = vpop.permute.xlu1 %687  ;;  %2206 = vmatprep.subr.bf16.mxu0 %v3508_v13  ;;  %v3522_v11 = vsub.f32 %v1070_v39, %v1127_v26 }
 0x1bf   :  { %v1386_v27 = vsub.f32 %v3506_v0, %v1385_v14  ;;  %v3520_v17 = vpack.c.bf16 %v1392_v21, %v1385_v14  ;;  %v1273_v22 = vand.u32 4294901760, %v3522_v11 }
 0x1c1   :  { %3964 = vst [vmem:[#allocation5_spill] sm:$0xff] %v3520_v17  ;;  %v1387_v1 = vand.u32 4294901760, %v1386_v27  ;;  %v1274_v39 = vsub.f32 %v3522_v11, %v1273_v22  ;;  %v1003_v27 = vpop.permute.xlu0 %1002  ;;  %v3968_v17 = vld [vmem:[#allocation19_spill] sm:$0xff] }
 0x1c2   :  { %v918_v45 = vpop.permute.xlu1 %917 }
 0x1c3   :  { %v1039_v58 = vadd.f32 %v918_v45, %v815_v10  ;;  %v2237_v52 = vpack.c.bf16 %v1394_v24, %v1387_v1  ;;  %v1275_v53 = vand.u32 4294901760, %v1274_v39  ;;  %v3967_v24 = vld [vmem:[#allocation35_spill] sm:$0xff] }
 0x1c4   :  { %v608_v45 = vmul.f32 %v3006_v51, %v3967_v24 }
 0x1c5   :  { %v1071_v7 = vmax.f32 %v1039_v58, 0.0  ;;  %2238 = vmatprep.subr.bf16.mxu1 %v2237_v52  ;;  %v1056_v58 = vadd.f32 %v1003_v27, %v3217_v3  ;;  %v801_v3 = vmul.f32 %v3016_v61, %v3492_v8  ;;  %v3972_v8 = vld [vmem:[#allocation11_spill] sm:$0xff] }
 0x1c7   :  { %v1130_v49 = vand.u32 4294901760, %v1071_v7  ;;  %v3524_v36 = vpop.permute.xlu1 %563 }
 0x1c9   :  { %v3527_v42 = vsub.f32 %v1071_v7, %v1130_v49  ;;  %v3529_v31 = vpack.c.bf16 %v1130_v49, %v1127_v26  ;;  %v248_v26 = vmul.f32 %v2996_v29, %v3220_v38  ;;  %v1088_v38 = vmax.f32 %v1056_v58, 0.0 }
 0x1cb   :  { %3965 = vst [vmem:[#allocation6_spill] sm:$0xff] %v3529_v31  ;;  %v1280_v21 = vand.u32 4294901760, %v3527_v42  ;;  %v3532_v57 = vpop.permute.xlu1 %495  ;;  %2208 = vmatpush3.bf16.msra.mxu0 %v3529_v31 }
 0x1cd   :  { %v1281_v14 = vsub.f32 %v3527_v42, %v1280_v21  ;;  %v3539_v25 = vpack.c.bf16 %v1280_v21, %v1273_v22  ;;  %v245_v22 = vmul.f32 %v2996_v29, %v3968_v17  ;;  %v3969_v21 = vld [vmem:[#allocation20_spill] sm:$0xff] }
 0x1ce   :  { %v409_v39 = vmul.f32 %v2998_v18, %v3969_v21 }
 0x1cf   :  { %3966 = vst [vmem:[#allocation16_spill] sm:$0xff] %v3539_v25  ;;  %v1282_v7 = vand.u32 4294901760, %v1281_v14 }
 0x1d0   :  { %v372_v49 = vpop.permute.xlu1 %371 }
 0x1d1   :  { %v412_v10 = vmul.f32 %v2998_v18, %v372_v49  ;;  %v2239_v1 = vpack.c.bf16 %v1282_v7, %v1275_v53  ;;  %v605_v53 = vmul.f32 %v3006_v51, %v3466_v4  ;;  %v441_v7 = vadd.f32 %v409_v39, %v245_v22 }
 0x1d2   :  { %v1181_v49 = vand.u32 4294901760, %v1088_v38  ;;  %v588_v4 = vmul.f32 %v3006_v51, %v3473_v40  ;;  %v229_v39 = vmul.f32 %v2996_v29, %v3972_v8 }
 0x1d3   :  { %v444_v52 = vadd.f32 %v412_v10, %v248_v26  ;;  %2240 = vmatpush3.bf16.msra.mxu1 %v2239_v1  ;;  %v637_v26 = vadd.f32 %v605_v53, %v441_v7  ;;  %v3970_v1 = vld [vmem:[#allocation52_spill] sm:$0xff]  ;;  %v393_v53 = vmul.f32 %v2998_v18, %v3973_v5  ;;  %v785_v5 = vmul.f32 %v3016_v61, %v3513_v44 }
 0x1d4   :  { %v228_v24 = vmul.f32 %v2996_v29, %v3970_v1  ;;  %v3563_v21 = vsub.f32 %v1088_v38, %v1181_v49  ;;  %v784_v38 = vmul.f32 %v3016_v61, %v3501_v15 }
 0x1d5   :  { %v3551_v14 = vpop.permute.xlu1 %755  ;;  %v3553_v25 = vadd.f32 %v608_v45, %v444_v52  ;;  %v833_v17 = vadd.f32 %v801_v3, %v637_v26  ;;  %v3971_v45 = vld [vmem:[#allocation28_spill] sm:$0xff]  ;;  %v425_v8 = vadd.f32 %v393_v53, %v229_v39 }
 0x1d6   :  { %v392_v58 = vmul.f32 %v2998_v18, %v3971_v45  ;;  %v3857_v3 = vand.u32 4294901760, %v3563_v21 }
 0x1d8   :  { %v424_v7 = vadd.f32 %v392_v58, %v228_v24  ;;  %v1400_v15 = vsub.f32 %v3563_v21, %v3857_v3 }
 0x1d9   :  { %v3559_v27 = vpop.permute.xlu1 %759 }
 0x1da   :  { %v620_v45 = vadd.f32 %v588_v4, %v424_v7  ;;  %v1401_v53 = vand.u32 4294901760, %v1400_v15  ;;  %v3980_v15 = vld [vmem:[#allocation32_spill] sm:$0xff] }
 0x1dc   :  { %v816_v58 = vadd.f32 %v784_v38, %v620_v45 }
 0x1de   :  { %v1008_v10 = vpop.permute.xlu1 %1007 }
 0x1df   :  { %v1057_v52 = vadd.f32 %v1008_v10, %v833_v17  ;;  %v3974_v10 = vld [vmem:[#allocation33_spill] sm:$0xff] }
 0x1e0   :  { %v589_v1 = vmul.f32 %v3006_v51, %v3974_v10 }
 0x1e1   :  { %v1089_v22 = vmax.f32 %v1057_v52, 0.0 }
 0x1e2   :  { %v621_v10 = vadd.f32 %v589_v1, %v425_v8  ;;  %v3977_v8 = vld [vmem:[#allocation54_spill] sm:$0xff] }
 0x1e3   :  { %v1184_v26 = vand.u32 4294901760, %v1089_v22  ;;  %v692_v17 = vpop.permute.xlu1 %691 }
 0x1e4   :  { %v817_v39 = vadd.f32 %v785_v5, %v621_v10  ;;  %v396_v10 = vmul.f32 %v2998_v18, %v3980_v15 }
 0x1e5   :  { %v3578_v40 = vsub.f32 %v1089_v22, %v1184_v26  ;;  %v3580_v52 = vpack.c.bf16 %v1184_v26, %v1181_v49 }
 0x1e7   :  { %3975 = vst [vmem:[#allocation36_spill] sm:$0xff] %v3580_v52  ;;  %v3858_v24 = vand.u32 4294901760, %v3578_v40  ;;  %2210 = vmatprep.subr.bf16.mxu0 %v3580_v52 }
 0x1e8   :  { %v923_v31 = vpop.permute.xlu1 %922 }
 0x1e9   :  { %v1040_v4 = vadd.f32 %v923_v31, %v816_v58  ;;  %v1407_v49 = vsub.f32 %v3578_v40, %v3858_v24  ;;  %v232_v58 = vmul.f32 %v2996_v29, %v3977_v8  ;;  %v3984_v8 = vld [vmem:[#allocation23_spill] sm:$0xff] }
 0x1ea   :  { %v249_v15 = vmul.f32 %v2996_v29, %v3984_v8  ;;  %v411_v8 = vmul.f32 %v2998_v18, %v3482_v60 }
 0x1eb   :  { %v1072_v22 = vmax.f32 %v1040_v4, 0.0  ;;  %v1408_v44 = vand.u32 4294901760, %v1407_v49  ;;  %v3981_v4 = vld [vmem:[#allocation53_spill] sm:$0xff] }
 0x1ec   :  { %v928_v7 = vpop.permute.xlu1 %927  ;;  %v230_v49 = vmul.f32 %v2996_v29, %v3981_v4  ;;  %v590_v4 = vmul.f32 %v3006_v51, %v3532_v57  ;;  %v802_v57 = vmul.f32 %v3016_v61, %v3551_v14  ;;  %v803_v14 = vmul.f32 %v3016_v61, %v3559_v27 }
 0x1ed   :  { %v1133_v26 = vand.u32 4294901760, %v1072_v22  ;;  %v1041_v13 = vadd.f32 %v928_v7, %v817_v39  ;;  %v2241_v52 = vpack.c.bf16 %v1408_v44, %v1401_v53  ;;  %v3982_v53 = vld [vmem:[#allocation22_spill] sm:$0xff]  ;;  %v3986_v39 = vld [vmem:[#allocation48_spill] sm:$0xff] }
 0x1ee   :  { %v413_v44 = vmul.f32 %v2998_v18, %v3982_v53  ;;  %v3983_v7 = vld [vmem:[#allocation30_spill] sm:$0xff] }
 0x1ef   :  { %v3592_v38 = vsub.f32 %v1072_v22, %v1133_v26  ;;  %v1073_v45 = vmax.f32 %v1041_v13, 0.0  ;;  %2242 = vmatprep.subr.bf16.mxu1 %v2241_v52 }
 0x1f1   :  { %3976 = vst [vmem:[#allocation41_spill] sm:$0xff] %v3592_v38  ;;  %v1287_v3 = vand.u32 4294901760, %v3592_v38  ;;  %v1136_v1 = vand.u32 4294901760, %v1073_v45  ;;  %v572_v31 = vpop.permute.xlu1 %571 }
 0x1f3   :  { %v3597_v24 = vsub.f32 %v1073_v45, %v1136_v1  ;;  %v3599_v5 = vpack.c.bf16 %v1136_v1, %v1133_v26  ;;  %v1288_v22 = vsub.f32 %v3592_v38, %v1287_v3  ;;  %v394_v26 = vmul.f32 %v2998_v18, %v3983_v7 }
 0x1f4   :  { %v428_v45 = vadd.f32 %v396_v10, %v232_v58  ;;  %v788_v38 = vmul.f32 %v3016_v61, %v3986_v39  ;;  %v786_v7 = vmul.f32 %v3016_v61, %v692_v17  ;;  %v609_v58 = vmul.f32 %v3006_v51, %v572_v31 }
 0x1f5   :  { %3978 = vst [vmem:[#allocation43_spill] sm:$0xff] %v3597_v24  ;;  %3979 = vst [vmem:[#allocation34_spill] sm:$0xff] %v3599_v5  ;;  %v1294_v13 = vand.u32 4294901760, %v3597_v24  ;;  %v504_v52 = vpop.permute.xlu1 %503  ;;  %2212 = vmatpush3.bf16.msra.mxu0 %v3599_v5  ;;  %v426_v53 = vadd.f32 %v394_v26, %v230_v49  ;;  %v1289_v10 = vand.u32 4294901760, %v1288_v22  ;;  %v3987_v49 = vld [vmem:[#allocation21_spill] sm:$0xff]  ;;  %v607_v17 = vmul.f32 %v3006_v51, %v3524_v36  ;;  %v933_v22 = vpop.permute.xlu0 %932 }
 0x1f6   :  { %v592_v1 = vmul.f32 %v3006_v51, %v504_v52  ;;  %v247_v26 = vmul.f32 %v2996_v29, %v3987_v49 }
 0x1f7   :  { %v1295_v5 = vsub.f32 %v3597_v24, %v1294_v13  ;;  %v3620_v63 = vpack.c.bf16 %v1294_v13, %v1287_v3  ;;  %v445_v13 = vadd.f32 %v413_v44, %v249_v15 }
 0x1f8   :  { %v624_v16 = vadd.f32 %v592_v1, %v428_v45  ;;  %v443_v60 = vadd.f32 %v411_v8, %v247_v26 }
 0x1f9   :  { %3985 = vst [vmem:[#allocation27_spill] sm:$0xff] %v3620_v63  ;;  %v1296_v52 = vand.u32 4294901760, %v1295_v5  ;;  %v622_v63 = vadd.f32 %v590_v4, %v426_v53  ;;  %v641_v5 = vadd.f32 %v609_v58, %v445_v13  ;;  %v3990_v58 = vld [vmem:[#allocation14_spill] sm:$0xff]  ;;  %v1028_v27 = vpop.permute.xlu0 %1027 }
 0x1fa   :  { %v764_v24 = vpop.permute.xlu1 %763  ;;  %v3630_v3 = vadd.f32 %v788_v38, %v624_v16  ;;  %v834_v16 = vadd.f32 %v802_v57, %v3228_v9  ;;  %v3988_v38 = vld [vmem:[#allocation47_spill] sm:$0xff]  ;;  %v639_v1 = vadd.f32 %v607_v17, %v443_v60  ;;  %v3991_v57 = vld [vmem:[#allocation37_spill] sm:$0xff] }
 0x1fb   :  { %v2243_v39 = vpack.c.bf16 %v1296_v52, %v1289_v10  ;;  %v818_v31 = vadd.f32 %v786_v7, %v622_v63  ;;  %v805_v44 = vmul.f32 %v3016_v61, %v3988_v38  ;;  %v3989_v63 = vld [vmem:[#allocation13_spill] sm:$0xff]  ;;  %v397_v52 = vmul.f32 %v2998_v18, %v3990_v58  ;;  %v1094_v18 = vld [vmem:[%s3834_s3] sm:$0xff]  ;;  %s2461_s3 = smov [#allocation2]  }
 0x1fc   :  { %v835_v36 = vadd.f32 %v803_v14, %v639_v1  ;;  %v233_v7 = vmul.f32 %v2996_v29, %v3989_v63  ;;  %s1971_s28 = sshll.u32 %s2461_s3, 4  ;;  %s1972_s28 = int_to_ptr.vmem [resolvable:$true] %s1971_s28 }
 0x1fd   :  { %2244 = vmatpush3.bf16.msra.mxu1 %v2243_v39  ;;  %v1042_v4 = vadd.f32 %v933_v22, %v818_v31  ;;  %v837_v53 = vadd.f32 %v805_v44, %v641_v5  ;;  %v593_v39 = vmul.f32 %v3006_v51, %v3991_v57  ;;  %s2433_s29 = scalar_lea.vmem %s1972_s28, 128  ;;  %p2438_p1 = scmp.lt.s32.totalorder %s1972_s28, %s1972_s28 }
 0x1fe   :  { %v429_v5 = vadd.f32 %v397_v52, %v233_v7  ;;  %p2434_p0 = scmp.ne.s32.totalorder %s1972_s28, %s2433_s29  ;;  %p2439_p2 = scmp.lt.s32.totalorder %s2433_s29, %s2433_s29 }
 0x1ff   :  { %v1013_v45 = vpop.permute.xlu1 %1012  ;;  %v1074_v49 = vmax.f32 %v1042_v4, 0.0  ;;  %v1061_v26 = vadd.f32 %v1028_v27, %v837_v53  ;;  %v948_v4 = vpop.permute.xlu0 %947  ;;  %v804_v53 = vmul.f32 %v3016_v61, %v764_v24  ;;  %v3992_v27 = vld [vmem:[#allocation46_spill] sm:$0xff] }
 0x200   :  { %v1058_v15 = vadd.f32 %v1013_v45, %v834_v16  ;;  %v625_v14 = vadd.f32 %v593_v39, %v429_v5  ;;  %p2440_p3 = por %p2439_p2, %p2438_p1 }
 0x201   :  { %v1093_v16 = vmax.f32 %v1061_v26, 0.0  ;;  %v1139_v44 = vand.u32 4294901760, %v1074_v49  ;;  %v836_v26 = vadd.f32 %v804_v53, %v3553_v25 }
 0x202   :  { %v1090_v10 = vmax.f32 %v1058_v15, 0.0  ;;  %v3658_v15 = vand.u32 4294901760, %v1094_v18  ;;  %p2441_p4 = pnand %p2440_p3, %p2434_p0 }
 0x203   :  { %v1018_v8 = vpop.permute.xlu1 %1017  ;;  %v3666_v52 = vsub.f32 %v1074_v49, %v1139_v44 }
 0x204   :  { %v1187_v13 = vand.u32 4294901760, %v1090_v10  ;;  %v1059_v9 = vadd.f32 %v1018_v8, %v835_v36  ;;  %v1196_v8 = vand.u32 4294901760, %v1093_v16  ;;  %v3673_v24 = vsub.f32 %v1094_v18, %v3658_v15 }
 0x206   :  { %v3647_v17 = vsub.f32 %v1090_v10, %v1187_v13  ;;  %v1091_v31 = vmax.f32 %v1059_v9, 0.0 }
 0x208   :  { %v1413_v22 = vand.u32 4294901760, %v3647_v17  ;;  %v1190_v60 = vand.u32 4294901760, %v1091_v31  ;;  %v704_v29 = vpop.permute.xlu1 %703 }
 0x209   :  { %v789_v38 = vmul.f32 %v3016_v61, %v704_v29  ;;  %v3676_v29 = vsub.f32 %v1093_v16, %v1196_v8 }
 0x20a   :  { %v3654_v51 = vsub.f32 %v1091_v31, %v1190_v60  ;;  %v3656_v45 = vpack.c.bf16 %v1190_v60, %v1187_v13  ;;  %v1414_v36 = vsub.f32 %v3647_v17, %v1413_v22 }
 0x20b   :  { %v821_v1 = vadd.f32 %v789_v38, %v625_v14  ;;  %v1301_v14 = vand.u32 4294901760, %v3666_v52 }
 0x20c   :  { %v1420_v10 = vand.u32 4294901760, %v3654_v51  ;;  %2214 = vmatprep.subr.bf16.mxu0 %v3656_v45  ;;  %v1415_v31 = vand.u32 4294901760, %v1414_v36  ;;  %v1434_v36 = vand.u32 4294901760, %v3676_v29 }
 0x20d   :  { %v1045_v7 = vadd.f32 %v948_v4, %v821_v1  ;;  %v938_v58 = vpop.permute.xlu1 %937  ;;  %v1302_v16 = vsub.f32 %v3666_v52, %v1301_v14 }
 0x20e   :  { %v1043_v13 = vadd.f32 %v938_v58, %v3992_v27  ;;  %v1421_v9 = vsub.f32 %v3654_v51, %v1420_v10  ;;  %v3670_v57 = vpack.c.bf16 %v1420_v10, %v1413_v22  ;;  %v3867_v22 = vand.u32 4294901760, %v3673_v24 }
 0x20f   :  { %v1077_v61 = vmax.f32 %v1045_v7, 0.0 }
 0x210   :  { %v1075_v39 = vmax.f32 %v1043_v13, 0.0  ;;  %v1422_v5 = vand.u32 4294901760, %v1421_v9 }
 0x211   :  { %v1023_v60 = vpop.permute.xlu1 %1022  ;;  %v1148_v49 = vand.u32 4294901760, %v1077_v61 }
 0x212   :  { %v1142_v38 = vand.u32 4294901760, %v1075_v39  ;;  %v1060_v1 = vadd.f32 %v1023_v60, %v836_v26  ;;  %v2245_v4 = vpack.c.bf16 %v1422_v5, %v1415_v31  ;;  %v1303_v5 = vand.u32 4294901760, %v1302_v16 }
 0x213   :  { %v3684_v53 = vsub.f32 %v1077_v61, %v1148_v49  ;;  %v1435_v60 = vsub.f32 %v3676_v29, %v1434_v36 }
 0x214   :  { %v3680_v10 = vsub.f32 %v1075_v39, %v1142_v38  ;;  %v1092_v18 = vmax.f32 %v1060_v1, 0.0  ;;  %2246 = vmatprep.subr.bf16.mxu1 %v2245_v4  ;;  %v3682_v7 = vpack.c.bf16 %v1142_v38, %v1139_v44  ;;  %v1207_v44 = vsub.f32 %v3673_v24, %v3867_v22 }
 0x215   :  { %v943_v25 = vpop.permute.xlu1 %942 }
 0x216   :  { %v1308_v58 = vand.u32 4294901760, %v3680_v10  ;;  %v1193_v27 = vand.u32 4294901760, %v1092_v18  ;;  %v1044_v13 = vadd.f32 %v943_v25, %v3630_v3  ;;  %2216 = vmatpush3.bf16.msra.mxu0 %v3682_v7  ;;  %v2279_v9 = vpack.c.bf16 %v3680_v10, %v3666_v52 }
 0x217   :  { %v1322_v3 = vand.u32 4294901760, %v3684_v53 }
 0x218   :  { %v3696_v61 = vsub.f32 %v1092_v18, %v1193_v27  ;;  %v1076_v39 = vmax.f32 %v1044_v13, 0.0  ;;  %v3698_v26 = vpack.c.bf16 %v1196_v8, %v1193_v27  ;;  %v1309_v31 = vsub.f32 %v3680_v10, %v1308_v58 }
 0x219   :  { %v3703_v38 = vpack.c.bf16 %v1308_v58, %v1301_v14  ;;  %v1208_v27 = vand.u32 4294901760, %v1207_v44  ;;  %v1436_v13 = vand.u32 4294901760, %v1435_v60  ;;  %v3995_v60 = vpack.c.bf16 %v3294_v28, %v3276_v47 }
 0x21a   :  { %v1427_v52 = vand.u32 4294901760, %v3696_v61  ;;  %v1145_v1 = vand.u32 4294901760, %v1076_v39  ;;  %2218 = vmatprep.subr.bf16.mxu0 %v3698_v26  ;;  %v1310_v4 = vand.u32 4294901760, %v1309_v31  ;;  %v2281_v18 = vpack.c.bf16 %v3676_v29, %v3696_v61 }
 0x21b   :  { %v1323_v31 = vsub.f32 %v3684_v53, %v1322_v3  ;;  %v3993_v29 = vpack.c.bf16 %v3107_v48, %v3142_v32  ;;  %v3996_v32 = vpack.c.bf16 %v3285_v34, %v3316_v33  ;;  %v3999_v47 = vpack.c.bf16 %v3406_v19, %v3424_v20  ;;  %v4008_v19 = vld [vmem:[#allocation25_spill] sm:$0xff] }
 0x21c   :  { %v1314_v8 = vsub.f32 %v1076_v39, %v1145_v1  ;;  %v3709_v25 = vpack.c.bf16 %v1148_v49, %v1145_v1  ;;  %v2247_v10 = vpack.c.bf16 %v1310_v4, %v1303_v5  ;;  %v1428_v16 = vsub.f32 %v3696_v61, %v1427_v52  ;;  %v4022_v1 = vld [vmem:[#allocation40_spill] sm:$0xff]  ;;  %v4023_v4 = vld [vmem:[#allocation39_spill] sm:$0xff] }
 0x21d   :  { %v3712_v22 = vpack.c.bf16 %v1434_v36, %v1427_v52  ;;  %v3994_v36 = vpack.c.bf16 %v3211_v12, %v3280_v56  ;;  %v1324_v5 = vand.u32 4294901760, %v1323_v31  ;;  %v3998_v12 = vpack.c.bf16 %v3366_v59, %v3337_v6  ;;  %v4006_v6 = vld [vmem:[#allocation41_spill] sm:$0xff]  ;;  %v4021_v52 = vld [vmem:[#allocation51_spill] sm:$0xff] }
 0x21e   :  { %v1315_v14 = vand.u32 4294901760, %v1314_v8  ;;  %2220 = vmatpush3.bf16.msra.mxu0 %v3709_v25  ;;  %2248 = vmatpush3.bf16.msra.mxu1 %v2247_v10  ;;  %v1429_v58 = vand.u32 4294901760, %v1428_v16  ;;  %v2283_v63 = vpack.c.bf16 %v3684_v53, %v1314_v8  ;;  %v3997_v53 = vpack.c.bf16 %v3320_v46, %v3300_v43  ;;  %v4005_v46 = vld [vmem:[#allocation43_spill] sm:$0xff] }
 0x21f   :  { %2254 = vmatprep.subr.bf16.mxu0 %v3993_v29  ;;  %v4000_v56 = vand.u32 4294901760, %v3447_v50  ;;  %v4001_v34 = vpack.c.bf16 %v3468_v54, %v3457_v35  ;;  %v4002_v28 = vpack.c.bf16 %v3495_v23, %v3506_v0  ;;  %v2273_v43 = vpack.c.bf16 %v3578_v40, %v3563_v21  ;;  %v4004_v35 = vld [vmem:[#allocation38_spill] sm:$0xff]  ;;  %v4012_v54 = vld [vmem:[#allocation36_spill] sm:$0xff]  ;;  %v4014_v0 = vld [vmem:[#allocation55_spill] sm:$0xff] }
 0x220   :  { %v2249_v49 = vpack.c.bf16 %v1436_v13, %v1429_v58  ;;  %v1316_v39 = vsub.f32 %v1314_v8, %v1315_v14  ;;  %v3720_v61 = vpack.c.bf16 %v1322_v3, %v1315_v14  ;;  %v4003_v33 = vpack.c.bf16 %v3527_v42, %v3522_v11  ;;  %v4011_v11 = vld [vmem:[#allocation6_spill] sm:$0xff]  ;;  %v4015_v42 = vld [vmem:[#allocation44_spill] sm:$0xff] }
 0x221   :  { %1209 = vmatmul.mubr.f32.vlgmr.msra.gmra.mrb[0].mxu0 %v1208_v27  ;;  %v4007_v59 = vpack.c.bf16 %v4005_v46, %v4006_v6  ;;  %v4009_v20 = vpack.c.bf16 %v3654_v51, %v3647_v17  ;;  %v4013_v23 = vld [vmem:[#allocation34_spill] sm:$0xff]  ;;  %v4016_v17 = vld [vmem:[#allocation24_spill] sm:$0xff]  ;;  %v4017_v51 = vld [vmem:[#allocation49_spill] sm:$0xff]  ;;  %v4020_v3 = vand.u32 4294901760, %v3673_v24 }
 0x222   :  { %2250 = vmatprep.subr.bf16.mxu1 %v2249_v49  ;;  %2256 = vmatpush3.bf16.msra.mxu0 %v3994_v36  ;;  %v1317_v44 = vand.u32 4294901760, %v1316_v39 }
 0x223   :  { %2258 = vmatprep.subr.bf16.mxu0 %v3995_v60  ;;  %1576 = vmatprep.mubr.f32.mxu0 %v3447_v50  ;;  %v4010_v50 = vld [vmem:[#allocation15_spill] sm:$0xff] }
 0x224   :  { %v2251_v48 = vpack.c.bf16 %v1324_v5, %v1317_v44 }
 0x226   :  { %2252 = vmatpush3.bf16.msra.mxu1 %v2251_v48  ;;  %2260 = vmatpush3.bf16.msra.mxu0 %v3996_v32 }
 0x227   :  { %2262 = vmatprep.subr.bf16.mxu0 %v3997_v53  ;;  %2286 = vmatprep.subr.bf16.mxu1 %v3140_v41 }
 0x229   :  { %1441 = vmatmul.mubr.f32.vlgmr.msra.gmra.mrb[0].mxu1 %v3658_v15 }
 0x22a   :  { %2264 = vmatpush3.bf16.msra.mxu0 %v3998_v12  ;;  %2288 = vmatpush3.bf16.msra.mxu1 %v3283_v55 }
 0x22b   :  { %2266 = vmatprep.subr.bf16.mxu0 %v3999_v47  ;;  %2290 = vmatprep.subr.bf16.mxu1 %v3296_v2 }
 0x22c   :  { %1683 = vmatprep.mubr.f32.mxu1 %v4000_v56 }
 0x22e   :  { %2268 = vmatpush3.bf16.msra.mxu0 %v4001_v34  ;;  %2292 = vmatpush3.bf16.msra.mxu1 %v3318_v30 }
 0x22f   :  { %2270 = vmatprep.subr.bf16.mxu0 %v4002_v28  ;;  %2294 = vmatprep.subr.bf16.mxu1 %v3322_v62 }
 0x232   :  { %2272 = vmatpush3.bf16.msra.mxu0 %v4003_v33  ;;  %2296 = vmatpush3.bf16.msra.mxu1 %v3368_v37 }
 0x233   :  { %2274 = vmatprep.subr.bf16.mxu0 %v2273_v43  ;;  %2298 = vmatprep.subr.bf16.mxu1 %v4004_v35 }
 0x236   :  { %2276 = vmatpush3.bf16.msra.mxu0 %v4007_v59  ;;  %2300 = vmatpush3.bf16.msra.mxu1 %v4008_v19 }
 0x237   :  { %2278 = vmatprep.subr.bf16.mxu0 %v4009_v20  ;;  %2302 = vmatprep.subr.bf16.mxu1 %v4010_v50 }
 0x23a   :  { %2280 = vmatpush3.bf16.msra.mxu0 %v2279_v9  ;;  %2304 = vmatpush3.bf16.msra.mxu1 %v4011_v11  ;;  %v4019_v9 = vld [vmem:[#allocation45_spill] sm:$0xff] }
 0x23b   :  { %2282 = vmatprep.subr.bf16.mxu0 %v2281_v18  ;;  %2306 = vmatprep.subr.bf16.mxu1 %v4012_v54  ;;  %v4024_v18 = vld [vmem:[#allocation5_spill] sm:$0xff] }
 0x23e   :  { %2284 = vmatpush3.bf16.msra.mxu0 %v2283_v63  ;;  %2308 = vmatpush3.bf16.msra.mxu1 %v4013_v23  ;;  %v4018_v63 = vld [vmem:[#allocation42_spill] sm:$0xff] }
 0x23f   :  { %2310 = vmatprep.subr.bf16.mxu1 %v3656_v45  ;;  %2318 = vmatprep.subr.bf16.mxu0 %v4014_v0 }
 0x241   :  { %1579 = vmatmul.mubr.f32.vlgmr.msra.gmra.mrb[2].mxu0 %v3673_v24  ;;  %v4026_v24 = vand.u32 4294901760, %v3578_v40  ;;  %v1100_v40 = vpop.permute.xlu1 %1099 }
 0x242   :  { %2312 = vmatpush3.bf16.msra.mxu1 %v3682_v7  ;;  %2320 = vmatpush3.bf16.msra.mxu0 %v4015_v42 }
 0x243   :  { %2314 = vmatprep.subr.bf16.mxu1 %v3698_v26  ;;  %2322 = vmatprep.subr.bf16.mxu0 %v4016_v17 }
 0x244   :  { %1853 = vmatprep.mubr.f32.mxu0 %v4017_v51 }
 0x246   :  { %2316 = vmatpush3.bf16.msra.mxu1 %v3709_v25  ;;  %2324 = vmatpush3.bf16.msra.mxu0 %v4018_v63 }
 0x247   :  { %2326 = vmatprep.subr.bf16.mxu0 %v4019_v9  ;;  %2350 = vmatprep.subr.bf16.mxu1 %v3140_v41  ;;  %v4025_v41 = vand.u32 4294901760, %v3563_v21 }
 0x249   :  { %1687 = vmatmul.mubr.f32.vlgmr.msra.gmra.mrb[2].mxu1 %v4020_v3  ;;  %v2337_v8 = vpack.c.bf16 %v4026_v24, %v4025_v41 }
 0x24a   :  { %2328 = vmatpush3.bf16.msra.mxu0 %v4021_v52  ;;  %2352 = vmatpush3.bf16.msra.mxu1 %v3283_v55  ;;  %v4027_v55 = vld [vmem:[#allocation16_spill] sm:$0xff] }
 0x24b   :  { %2330 = vmatprep.subr.bf16.mxu0 %v4022_v1  ;;  %2354 = vmatprep.subr.bf16.mxu1 %v3296_v2  ;;  %v4028_v2 = vld [vmem:[#allocation27_spill] sm:$0xff] }
 0x24c   :  { %1957 = vmatprep.mubr.f32.mxu1 %v4017_v51 }
 0x24e   :  { %2332 = vmatpush3.bf16.msra.mxu0 %v4023_v4  ;;  %2356 = vmatpush3.bf16.msra.mxu1 %v3318_v30 }
 0x24f   :  { %2334 = vmatprep.subr.bf16.mxu0 %v4024_v18  ;;  %2358 = vmatprep.subr.bf16.mxu1 %v3322_v62 }
 0x252   :  { %2336 = vmatpush3.bf16.msra.mxu0 %v4027_v55  ;;  %2360 = vmatpush3.bf16.msra.mxu1 %v3368_v37 }
 0x253   :  { %2338 = vmatprep.subr.bf16.mxu0 %v2337_v8  ;;  %2362 = vmatprep.subr.bf16.mxu1 %v4004_v35 }
 0x256   :  { %2340 = vmatpush3.bf16.msra.mxu0 %v4028_v2  ;;  %2364 = vmatpush3.bf16.msra.mxu1 %v4008_v19 }
 0x257   :  { %2342 = vmatprep.subr.bf16.mxu0 %v3670_v57  ;;  %2366 = vmatprep.subr.bf16.mxu1 %v4010_v50 }
 0x25a   :  { %2344 = vmatpush3.bf16.msra.mxu0 %v3703_v38  ;;  %2368 = vmatpush3.bf16.msra.mxu1 %v4011_v11 }
 0x25b   :  { %2346 = vmatprep.subr.bf16.mxu0 %v3712_v22  ;;  %2370 = vmatprep.subr.bf16.mxu1 %v4012_v54 }
 0x25e   :  { %2348 = vmatpush3.bf16.msra.mxu0 %v3720_v61  ;;  %2372 = vmatpush3.bf16.msra.mxu1 %v4013_v23 }
 0x25f   :  { %2374 = vmatprep.subr.bf16.mxu1 %v3656_v45 }
 0x261   :  { %1855 = vmatmul.mubr.f32.vlgmr.msra.gmra.mrb[4].mxu0 %v3658_v15 }
 0x262   :  { %2376 = vmatpush3.bf16.msra.mxu1 %v3682_v7 }
 0x263   :  { %2378 = vmatprep.subr.bf16.mxu1 %v3698_v26 }
 0x266   :  { %2380 = vmatpush3.bf16.msra.mxu1 %v3709_v25 }
 0x269   :  { %1959 = vmatmul.mubr.f32.vlgmr.msra.gmra.mrb[4].mxu1 %v3658_v15 }
 0x2f4   :  { %v2011_v30 = vpop.f32.mrb[0].mxu0 }
 0x2f5   :  { %v2012_v62 = vpop.f32.mrb[1].mxu0 }
 0x2f6   :  { %v2013_v37 = vadd.f32 %v2012_v62, %v2011_v30 }
 0x2f8   :  { %v1211_v22 = vadd.f32 %v2013_v37, %v1100_v40 }
 0x2fc   :  { %v2046_v21 = vpop.f32.mrb[0].mxu1 }
 0x2fd   :  { %v2047_v57 = vpop.f32.mrb[1].mxu1 }
 0x2fe   :  { %v2048_v38 = vadd.f32 %v2047_v57, %v2046_v21 }
 0x300   :  { %v1443_v10 = vadd.f32 %v2048_v38, %v1211_v22 }
 0x314   :  { %v2081_v45 = vpop.f32.mrb[2].mxu0 }
 0x315   :  { %v2082_v16 = vpop.f32.mrb[3].mxu0 }
 0x316   :  { %v2083_v27 = vadd.f32 %v2082_v16, %v2081_v45 }
 0x318   :  { %v1581_v13 = vadd.f32 %v2083_v27, %v1443_v10 }
 0x31c   :  { %v2116_v7 = vpop.f32.mrb[2].mxu1 }
 0x31d   :  { %v2117_v14 = vpop.f32.mrb[3].mxu1 }
 0x31e   :  { %v2118_v26 = vadd.f32 %v2117_v14, %v2116_v7 }
 0x320   :  { %v1689_v58 = vadd.f32 %v2118_v26, %v1581_v13 }
 0x334   :  { %v2151_v25 = vpop.f32.mrb[4].mxu0 }
 0x335   :  { %v2152_v31 = vpop.f32.mrb[5].mxu0 }
 0x336   :  { %v2153_v15 = vadd.f32 %v2152_v31, %v2151_v25 }
 0x338   :  { %v1857_v29 = vadd.f32 %v2153_v15, %v1689_v58 }
 0x33c   :  { %v2186_v49 = vpop.f32.mrb[4].mxu1 }
 0x33d   :  { %v2187_v39 = vpop.f32.mrb[5].mxu1 }
 0x33e   :  { %v2188_v61 = vadd.f32 %v2187_v39, %v2186_v49 }
 0x340   :  { %v1961_v36 = vadd.f32 %v2188_v61, %v1857_v29 }
 0x342   :  { %1964 = vst [vmem:[#allocation2] sm:$0xff] %v1961_v36 }
 0x343   :  { %2444 = shalt.err (!%p2441_p4)
}
 0x344   :  { %s2445_s7 = scalar_lea.hbm %s3836_s5, 128 }
 0x345   :  { %p2446_p5 = scmp.ne.s32.totalorder %s3836_s5, %s2445_s7  ;;  %p2449_p6 = scmp.lt.u32.totalorder %s2445_s7, %s3836_s5 }
 0x347   :  { %p2451_p7 = pnand %p2449_p6, %p2446_p5 }
 0x349   :  { %2454 = shalt.err (!%p2451_p7)
}
 0x34a   :  { %1974 = dma.vmem_to_hbm [thread:$0]  %s1972_s28, 128, %s3836_s5, [#allocation3]  }
 0x34b   :  { %2455 = dma.done.wait [#allocation3], 128  }
 0x34c   :  { %2456 = vsyncadd [#allocation3], 4294967168 }
 0x34d   :  { %1978 = vsyncpa [#allocation3], 1 }

</bundles_post_ra>
